<compile_context>
chip_gen: v7x
topology: tpu7x:2x2x1
jax: 0.10.0
libtpu: 0.0.40
codegen_flags: <defaults>
</compile_context>

<pallas_src>
import functools

import numpy as np
import jax
import jax.numpy as jnp
from jax.experimental import pallas as pl
from jax.experimental.pallas import tpu as pltpu

EPS = 1e-5               # nn.BatchNorm1d default eps
LEAKY_SLOPE = 0.01       # nn.LeakyReLU default negative_slope
INV_SQRT2 = 0.7071067811865476
INV_1414 = 1.0 / 1.414


# ----------------------------------------------------------------------------
# elementwise helpers (shared by kernel and jnp reference)
# ----------------------------------------------------------------------------
def _erf(x, recip):
    # erf via Abramowitz & Stegun 7.1.26 (|abs err| < 1.5e-7).
    a1, a2, a3, a4, a5 = 0.254829592, -0.284496736, 1.421413741, -1.453152027, 1.061405429
    p = 0.3275911
    sgn = jnp.where(x >= 0.0, 1.0, -1.0)
    ax = jnp.abs(x)
    t = recip(1.0 + p * ax)
    poly = ((((a5 * t + a4) * t + a3) * t + a2) * t + a1) * t
    return sgn * (1.0 - poly * jnp.exp(-ax * ax))


def _gelu(x, recip=lambda v: 1.0 / v):
    # exact (erf-based) GELU, matching nn.GELU() default
    return 0.5 * x * (1.0 + _erf(x * INV_SQRT2, recip))


# kernel-side GELU: the reciprocal goes to the EUP slot (exact, not approx)
_gelu_kernel = functools.partial(_gelu, recip=lambda v: pl.reciprocal(v, approx=False))


def _leaky_relu(x):
    return jnp.where(x >= 0.0, x, LEAKY_SLOPE * x)


def _batchnorm_train(x, gamma, beta):
    # BatchNorm1d in training mode (biased batch statistics), single-pass var.
    mean = jnp.mean(x, axis=0, keepdims=True)
    mean_sq = jnp.mean(x * x, axis=0, keepdims=True)
    var = mean_sq - mean * mean
    return gamma * (x - mean) * jax.lax.rsqrt(var + EPS) + beta


# ----------------------------------------------------------------------------
# parameter packing (host side, done once)
# ----------------------------------------------------------------------------
def _pad8(n):
    return ((n + 7) // 8) * 8


def _segments(x_dim, y_dim, E, H, CW):
    """Row offsets (8-aligned) of each segment inside the single packed slab."""
    AIN = x_dim + y_dim + 2                       # [x | y | t | ctx]
    order = (("emb1", AIN), ("emb2", CW), ("fc1yt", CW),
             ("w2h", H), ("w3h", H), ("w4h", H), ("rows", 12))
    offs, r = {}, 0
    for name, n in order:
        offs[name] = r
        r += _pad8(n)
    return offs, r


PARAM_ORDER = [
    "wx1", "bx1", "wx2", "bx2",
    "wy1", "by1", "wy2", "by2",
    "wt1", "wt2", "bt2",
    "w1x", "w1y", "w1t", "b1", "g1", "be1",
    "w2h", "w2y", "w2t", "b2", "g2", "be2",
    "w3h", "w3y", "w3t", "b3", "g3", "be3",
    "w4h", "w4y", "w4t", "b4",
]


def init_params(key, x_dim, y_dim, embed_dim, n_hidden, output_dim):
    """Logical parameter set (nn.Linear weights stored as (in, out))."""
    E, H = embed_dim, n_hidden
    shapes = {
        "wx1": (x_dim, E), "bx1": (1, E), "wx2": (E, E), "bx2": (1, E),
        "wy1": (y_dim, E), "by1": (1, E), "wy2": (E, E), "by2": (1, E),
        "wt1": (1, E), "wt2": (E, E), "bt2": (1, E),
        "w1x": (E, H), "w1y": (E, H), "w1t": (E, H),
        "b1": (1, H), "g1": (1, H), "be1": (1, H),
        "w2h": (H, H), "w2y": (y_dim, H), "w2t": (1, H),
        "b2": (1, H), "g2": (1, H), "be2": (1, H),
        "w3h": (H, H), "w3y": (y_dim, H), "w3t": (1, H),
        "b3": (1, H), "g3": (1, H), "be3": (1, H),
        "w4h": (H, output_dim), "w4y": (y_dim, output_dim),
        "w4t": (1, output_dim), "b4": (1, output_dim),
    }
    params = {}
    keys = jax.random.split(key, len(PARAM_ORDER))
    for kk, name in zip(keys, PARAM_ORDER):
        shp = shapes[name]
        if name.startswith("g"):        # BatchNorm gamma -> ones
            params[name] = jnp.ones(shp, jnp.float32)
        elif name.startswith("be"):     # BatchNorm beta -> zeros
            params[name] = jnp.zeros(shp, jnp.float32)
        elif name.startswith("b"):      # Linear bias
            params[name] = 0.01 * jax.random.normal(kk, shp, jnp.float32)
        else:                           # Linear weight
            params[name] = 0.1 * jax.random.normal(kk, shp, jnp.float32)
    return params


def pack_params(params, x_dim, y_dim, E, H, OUT):
    """Pack all 32 logical tensors into ONE (R, CW) slab (CW multiple of 128)."""
    p = {k: np.asarray(v, np.float32) for k, v in params.items()}
    E3, PT = 3 * E, y_dim + 1
    AIN = x_dim + y_dim + 2
    CW = 128 * int(np.ceil(max(E3 + PT, 3 * H + OUT, AIN) / 128))
    offs, R = _segments(x_dim, y_dim, E, H, CW)
    W = np.zeros((R, CW), np.float32)

    # emb1: block-diag first layers of the x / y / t embeddings, plus an
    # identity passthrough carrying raw (y, t) into lanes [3E, 3E+PT); the
    # trailing ctx column of the activation slab maps to an all-zero row.
    o = offs["emb1"]
    W[o:o + x_dim, 0:E] = p["wx1"]
    W[o + x_dim:o + x_dim + y_dim, E:2 * E] = p["wy1"]
    W[o + x_dim + y_dim:o + x_dim + y_dim + 1, 2 * E:3 * E] = p["wt1"]   # TimeSiren lin1 (no bias)
    for j in range(PT):                                                   # [y | t] passthrough
        W[o + x_dim + j, E3 + j] = 1.0

    # emb2: block-diag second layers + identity on the passthrough lanes.
    o = offs["emb2"]
    W[o:o + E, 0:E] = p["wx2"]
    W[o + E:o + 2 * E, E:2 * E] = p["wy2"]
    W[o + 2 * E:o + 3 * E, 2 * E:3 * E] = p["wt2"]
    for j in range(PT):
        W[o + E3 + j, E3 + j] = 1.0

    # fused fc1 + (y,t)->{fc2,fc3,fc4}: K = embedding lanes, cols [h1|c2|c3|c4].
    o = offs["fc1yt"]
    W[o:o + E3, 0:H] = np.concatenate([p["w1x"], p["w1y"], p["w1t"]], axis=0)
    W[o + E3:o + E3 + y_dim, H:2 * H] = p["w2y"]
    W[o + E3 + y_dim:o + E3 + PT, H:2 * H] = p["w2t"]
    W[o + E3:o + E3 + y_dim, 2 * H:3 * H] = p["w3y"]
    W[o + E3 + y_dim:o + E3 + PT, 2 * H:3 * H] = p["w3t"]
    W[o + E3:o + E3 + y_dim, 3 * H:3 * H + OUT] = p["w4y"]
    W[o + E3 + y_dim:o + E3 + PT, 3 * H:3 * H + OUT] = p["w4t"]

    # residual-chain weights
    W[offs["w2h"]:offs["w2h"] + H, 0:H] = p["w2h"]
    W[offs["w3h"]:offs["w3h"] + H, 0:H] = p["w3h"]
    W[offs["w4h"]:offs["w4h"] + H, 0:OUT] = p["w4h"]

    # row parameters (biases / BN gamma / BN beta), folded into the same slab.
    o = offs["rows"]
    W[o + 0, 0:E] = p["bx1"][0]; W[o + 0, E:2 * E] = p["by1"][0]
    W[o + 1, 0:E] = p["bx2"][0]; W[o + 1, E:2 * E] = p["by2"][0]; W[o + 1, 2 * E:3 * E] = p["bt2"][0]
    W[o + 2, 0:H] = p["b1"][0]; W[o + 3, 0:H] = p["g1"][0]; W[o + 4, 0:H] = p["be1"][0]
    W[o + 5, 0:H] = p["b2"][0]; W[o + 6, 0:H] = p["g2"][0]; W[o + 7, 0:H] = p["be2"][0]
    W[o + 8, 0:H] = p["b3"][0]; W[o + 9, 0:H] = p["g3"][0]; W[o + 10, 0:H] = p["be3"][0]
    W[o + 11, 0:OUT] = p["b4"][0]

    return jnp.asarray(W)


def pack_acts(y, x, t, context_mask):
    """Assemble the [x | y | t | ctx] activation slab (built once per stack)."""
    y = jnp.asarray(y, jnp.float32)
    x = jnp.asarray(x, jnp.float32)
    t = jnp.asarray(t, jnp.float32)
    ctx = jnp.asarray(context_mask, jnp.float32)
    if t.ndim == y.ndim - 1:
        t = t[..., None]
    if ctx.ndim == y.ndim - 1:
        ctx = ctx[..., None]
    return jnp.concatenate([x, y, t, ctx], axis=-1)


# ----------------------------------------------------------------------------
# Pallas kernel
# ----------------------------------------------------------------------------
def make_kernel(x_dim, y_dim, E, H, OUT, CW, offs):
    E3 = 3 * E
    AIN = x_dim + y_dim + 2

    def kernel(acts_ref, w_ref, out_ref):
        dot = functools.partial(jnp.dot, preferred_element_type=jnp.float32)
        ro = offs["rows"]

        def wseg(name, nrows):
            o = offs[name]
            return w_ref[o:o + nrows, :]

        def prow(i, ncols=CW):
            return w_ref[ro + i:ro + i + 1, :ncols]

        acts = acts_ref[0]                         # (B, AIN) = [x | y | t | ctx]
        ctx = acts[:, AIN - 1:AIN]                 # (B, 1) context mask (0/1)
        lane = jax.lax.broadcasted_iota(jnp.int32, (1, CW), 1)

        # --- fused block-diagonal embedding MLPs + (y,t) lane passthrough -----
        # lanes [0,2E): Linear+LeakyReLU (x,y); [2E,3E): sin (TimeSiren t);
        # lanes >= 3E: identity (raw y,t passthrough + zero padding).
        h = dot(acts, wseg("emb1", AIN)) + prow(0)
        h = jnp.where(lane < 2 * E, _leaky_relu(h),
                      jnp.where(lane < E3, jnp.sin(h), h))
        emb = dot(h, wseg("emb2", CW)) + prow(1)
        # context masking: x_e = x_e * (-(1 - mask)); y_e / t_e / passthrough untouched
        emb = emb * jnp.where(lane < E, -(1.0 - ctx), 1.0)

        # --- ONE MXU pass: fc1 pre-act + (y,t) contributions of fc2/fc3/fc4 ---
        f = dot(emb, wseg("fc1yt", CW))
        h1 = f[:, :H] + prow(2, H)
        c2 = f[:, H:2 * H]
        c3 = f[:, 2 * H:3 * H]
        c4 = f[:, 3 * H:3 * H + OUT]

        # --- fc1 = FCBlock(3E -> H) ---------------------------------------------
        nn1 = _gelu_kernel(_batchnorm_train(h1, prow(3, H), prow(4, H)))
        # --- fc2 = FCBlock(H+y_dim+1 -> H) on cat(nn1/1.414, y, t) + residual ---
        h2 = dot(nn1 * INV_1414, wseg("w2h", H))[:, :H] + c2 + prow(5, H)
        nn2 = _gelu_kernel(_batchnorm_train(h2, prow(6, H), prow(7, H))) + nn1 * INV_1414
        # --- fc3 ------------------------------------------------------------------
        h3 = dot(nn2 * INV_1414, wseg("w3h", H))[:, :H] + c3 + prow(8, H)
        nn3 = _gelu_kernel(_batchnorm_train(h3, prow(9, H), prow(10, H))) + nn2 * INV_1414
        # --- fc4 = Linear(H+y_dim+1 -> output_dim) on cat(nn3, y, t) -------------
        out = dot(nn3, wseg("w4h", H))[:, :OUT] + c4 + prow(11, OUT)
        out_ref[0] = out.astype(out_ref.dtype)

    return kernel


# ----------------------------------------------------------------------------
# wrappers
# ----------------------------------------------------------------------------
def model_mlp_diff_forward_stacked(acts, w_big, x_dim, y_dim, E, H, OUT):
    """T stacked independent forwards in one pallas_call.

    acts: (T, B, x_dim + y_dim + 2) built with pack_acts.  The weight slab is
    VMEM-resident across the grid (constant index_map); only per-step
    activations / outputs stream.  BatchNorm stats are per step (full batch).
    """
    T, B, AIN = acts.shape
    assert AIN == x_dim + y_dim + 2
    R, CW = w_big.shape
    offs, R_expected = _segments(x_dim, y_dim, E, H, CW)
    assert R == R_expected, "weight slab does not match model dims"

    kernel = make_kernel(x_dim, y_dim, E, H, OUT, CW, offs)

    flops = 2 * T * B * (AIN * CW + 2 * CW * CW + 3 * H * CW)
    transcendentals = T * B * (E + 6 * H)                      # sin + exp/rsqrt per BN-GELU
    bytes_accessed = 4 * (int(w_big.size) + int(acts.size) + T * B * OUT)

    return pl.pallas_call(
        kernel,
        out_shape=jax.ShapeDtypeStruct((T, B, OUT), jnp.float32),
        grid=(T,),
        in_specs=[
            pl.BlockSpec((1, B, AIN), lambda s: (s, 0, 0)),    # per-step activations stream
            pl.BlockSpec((R, CW), lambda s: (0, 0)),           # packed weights: VMEM-resident
        ],
        out_specs=pl.BlockSpec((1, B, OUT), lambda s: (s, 0, 0)),
        compiler_params=pltpu.CompilerParams(
            dimension_semantics=("parallel",),                 # steps independent -> both v7x TCs
            vmem_limit_bytes=32 * 1024 * 1024),                # explicit, safe on v5e/v6e/v7x
        cost_estimate=pl.CostEstimate(
            flops=flops, transcendentals=transcendentals, bytes_accessed=bytes_accessed),
    )(acts.astype(jnp.float32), w_big)


def model_mlp_diff_forward(y, x, t, context_mask, w_big, x_dim, y_dim, E, H, OUT):
    """Single-call Pallas forward of Model_mlp_diff_embed (net_type='fc')."""
    acts = pack_acts(y, x, t, context_mask)[None]              # (1, B, AIN)
    return model_mlp_diff_forward_stacked(acts, w_big, x_dim, y_dim, E, H, OUT)[0]


# ----------------------------------------------------------------------------
# plain-JAX reference (unfused math, same nonlinearities) — correctness guard
# ----------------------------------------------------------------------------
def reference_forward(y, x, t, context_mask, params):
    hp = functools.partial(jnp.dot, precision=jax.lax.Precision.HIGHEST)
    B = y.shape[0]
    ctx = context_mask.reshape(B, 1).astype(jnp.float32)
    x_e = hp(_leaky_relu(hp(x, params["wx1"]) + params["bx1"]), params["wx2"]) + params["bx2"]
    y_e = hp(_leaky_relu(hp(y, params["wy1"]) + params["by1"]), params["wy2"]) + params["by2"]
    t_e = hp(jnp.sin(t * params["wt1"]), params["wt2"]) + params["bt2"]
    x_e = x_e * (-(1.0 - ctx))
    h1 = hp(x_e, params["w1x"]) + hp(y_e, params["w1y"]) + hp(t_e, params["w1t"]) + params["b1"]
    nn1 = _gelu(_batchnorm_train(h1, params["g1"], params["be1"]))
    h2 = hp(nn1 * INV_1414, params["w2h"]) + hp(y, params["w2y"]) + t * params["w2t"] + params["b2"]
    nn2 = _gelu(_batchnorm_train(h2, params["g2"], params["be2"])) + nn1 * INV_1414
    h3 = hp(nn2 * INV_1414, params["w3h"]) + hp(y, params["w3y"]) + t * params["w3t"] + params["b3"]
    nn3 = _gelu(_batchnorm_train(h3, params["g3"], params["be3"])) + nn2 * INV_1414
    return hp(nn3, params["w4h"]) + hp(y, params["w4y"]) + t * params["w4t"] + params["b4"]


if __name__ == "__main__":
    B, x_dim, y_dim, embed_dim, n_hidden = 8, 16, 4, 32, 32
    output_dim = y_dim           # output_dim=None in the module -> y_dim
    T = 4                        # stacked independent forward passes

    key = jax.random.PRNGKey(0)
    k_params, k_y, k_x, k_t, k_m = jax.random.split(key, 5)
    params = init_params(k_params, x_dim, y_dim, embed_dim, n_hidden, output_dim)
    w_big = pack_params(params, x_dim, y_dim, embed_dim, n_hidden, output_dim)

    y = jax.random.normal(k_y, (T, B, y_dim), jnp.float32)
    x = jax.random.normal(k_x, (T, B, x_dim), jnp.float32)
    t = jax.random.uniform(k_t, (T, B, 1), jnp.float32)
    context_mask = jax.random.bernoulli(k_m, 0.5, (T, B)).astype(jnp.float32)

    # stacked (amortized launch + weight DMA) path
    acts = pack_acts(y, x, t, context_mask)                    # (T, B, 22), built once
    out = model_mlp_diff_forward_stacked(acts, w_big, x_dim, y_dim,
                                         embed_dim, n_hidden, output_dim)
    jax.block_until_ready(out)
    assert out.shape == (T, B, output_dim)
    assert bool(jnp.all(jnp.isfinite(out)))

    for s in range(T):
        ref = reference_forward(y[s], x[s], t[s], context_mask[s], params)
        assert bool(jnp.allclose(out[s], ref, atol=2e-4, rtol=2e-3)), f"mismatch at step {s}"

    # single-call path (T = 1)
    out0 = model_mlp_diff_forward(y[0], x[0], t[0], context_mask[0], w_big,
                                  x_dim, y_dim, embed_dim, n_hidden, output_dim)
    jax.block_until_ready(out0)
    assert out0.shape == (B, output_dim)
    assert bool(jnp.allclose(out0, out[0], atol=1e-5, rtol=1e-5))

    print("KERNEL_OK")
</pallas_src>

<mosaic_0001>
module attributes {stable_mosaic.version = 11 : i64} {
  func.func @kernel(%arg0: i32, %arg1: memref<1x8x22xf32, #tpu.memory_space<vmem>>, %arg2: memref<392x128xf32, #tpu.memory_space<vmem>>, %arg3: memref<1x8x4xf32, #tpu.memory_space<vmem>>) attributes {dimension_semantics = [#tpu.dimension_semantics<parallel>], iteration_bounds = array<i64: 4>, scalar_prefetch = 0 : i64, scratch_operands = 0 : i64, tpu.core_type = #tpu.core_type<tc>, window_params = [{transform_indices = @transform_0, window_bounds = array<i64: 1, 8, 22>}, {pipeline_mode = #tpu.pipeline_mode<synchronous>, transform_indices = @transform_1, window_bounds = array<i64: 392, 128>}, {transform_indices = @transform_2, window_bounds = array<i64: 1, 8, 4>}]} {
    %c0 = arith.constant 0 : index
    %c0_0 = arith.constant 0 : index
    %c0_1 = arith.constant 0 : index
    %0 = vector.load %arg1[%c0, %c0_0, %c0_1] : memref<1x8x22xf32, #tpu.memory_space<vmem>>, vector<1x8x22xf32>
    %1 = vector.shape_cast %0 : vector<1x8x22xf32> to vector<8x22xf32>
    %2 = vector.extract_strided_slice %1 {offsets = [0, 21], sizes = [8, 1], strides = [1, 1]} : vector<8x22xf32> to vector<8x1xf32>
    %3 = tpu.iota {dimensions = array<i32: 1>} : vector<1x128xi32>
    %c0_2 = arith.constant 0 : index
    %c0_3 = arith.constant 0 : index
    %4 = vector.load %arg2[%c0_2, %c0_3] : memref<392x128xf32, #tpu.memory_space<vmem>>, vector<22x128xf32>
    %cst = arith.constant dense<0.000000e+00> : vector<8x128xf32>
    %5 = tpu.matmul %1, %4, %cst {dimension_numbers = #tpu.dot_dimension_numbers<[1], [0], [0], [1], [0, 0, 1, 1], [], []>} : vector<8x22xf32>, vector<22x128xf32>, vector<8x128xf32> -> vector<8x128xf32>
    %c376 = arith.constant 376 : index
    %c0_4 = arith.constant 0 : index
    %6 = vector.load %arg2[%c376, %c0_4] : memref<392x128xf32, #tpu.memory_space<vmem>>, vector<1x128xf32>
    %7 = vector.broadcast %6 : vector<1x128xf32> to vector<8x128xf32>
    %8 = arith.addf %5, %7 : vector<8x128xf32>
    %c64_i32 = arith.constant 64 : i32
    %9 = vector.broadcast %c64_i32 : i32 to vector<1x128xi32>
    %10 = arith.cmpi slt, %3, %9 : vector<1x128xi32>
    %cst_5 = arith.constant 0.000000e+00 : f32
    %11 = vector.broadcast %cst_5 : f32 to vector<8x128xf32>
    %12 = arith.cmpf oge, %8, %11 : vector<8x128xf32>
    %cst_6 = arith.constant 0.00999999977 : f32
    %13 = vector.broadcast %cst_6 : f32 to vector<8x128xf32>
    %14 = arith.mulf %13, %8 : vector<8x128xf32>
    %15 = arith.select %12, %8, %14 : vector<8x128xi1>, vector<8x128xf32>
    %c96_i32 = arith.constant 96 : i32
    %16 = vector.broadcast %c96_i32 : i32 to vector<1x128xi32>
    %17 = arith.cmpi slt, %3, %16 : vector<1x128xi32>
    %18 = math.sin %8 : vector<8x128xf32>
    %19 = vector.shape_cast %17 : vector<1x128xi1> to vector<1x128xi1>
    %20 = vector.broadcast %19 : vector<1x128xi1> to vector<8x128xi1>
    %21 = arith.select %20, %18, %8 : vector<8x128xi1>, vector<8x128xf32>
    %22 = vector.shape_cast %10 : vector<1x128xi1> to vector<1x128xi1>
    %23 = vector.broadcast %22 : vector<1x128xi1> to vector<8x128xi1>
    %24 = arith.select %23, %15, %21 : vector<8x128xi1>, vector<8x128xf32>
    %c24 = arith.constant 24 : index
    %c0_7 = arith.constant 0 : index
    %25 = vector.load %arg2[%c24, %c0_7] : memref<392x128xf32, #tpu.memory_space<vmem>>, vector<128x128xf32>
    %cst_8 = arith.constant dense<0.000000e+00> : vector<8x128xf32>
    %26 = tpu.matmul %24, %25, %cst_8 {dimension_numbers = #tpu.dot_dimension_numbers<[1], [0], [0], [1], [0, 0, 1, 1], [], []>} : vector<8x128xf32>, vector<128x128xf32>, vector<8x128xf32> -> vector<8x128xf32>
    %c377 = arith.constant 377 : index
    %c0_9 = arith.constant 0 : index
    %27 = vector.load %arg2[%c377, %c0_9] : memref<392x128xf32, #tpu.memory_space<vmem>>, vector<1x128xf32>
    %28 = vector.broadcast %27 : vector<1x128xf32> to vector<8x128xf32>
    %29 = arith.addf %26, %28 : vector<8x128xf32>
    %c32_i32 = arith.constant 32 : i32
    %30 = vector.broadcast %c32_i32 : i32 to vector<1x128xi32>
    %31 = arith.cmpi slt, %3, %30 : vector<1x128xi32>
    %cst_10 = arith.constant 1.000000e+00 : f32
    %32 = vector.broadcast %cst_10 : f32 to vector<8x1xf32>
    %33 = arith.subf %32, %2 : vector<8x1xf32>
    %cst_11 = arith.constant 0.000000e+00 : f32
    %34 = vector.broadcast %cst_11 : f32 to vector<8x1xf32>
    %35 = arith.subf %34, %33 : vector<8x1xf32>
    %cst_12 = arith.constant 1.000000e+00 : f32
    %36 = vector.shape_cast %31 : vector<1x128xi1> to vector<1x128xi1>
    %37 = vector.broadcast %36 : vector<1x128xi1> to vector<8x128xi1>
    %38 = vector.shape_cast %35 : vector<8x1xf32> to vector<8x1xf32>
    %39 = vector.broadcast %38 : vector<8x1xf32> to vector<8x128xf32>
    %40 = vector.broadcast %cst_12 : f32 to vector<8x128xf32>
    %41 = arith.select %37, %39, %40 : vector<8x128xi1>, vector<8x128xf32>
    %42 = arith.mulf %29, %41 : vector<8x128xf32>
    %c152 = arith.constant 152 : index
    %c0_13 = arith.constant 0 : index
    %43 = vector.load %arg2[%c152, %c0_13] : memref<392x128xf32, #tpu.memory_space<vmem>>, vector<128x128xf32>
    %cst_14 = arith.constant dense<0.000000e+00> : vector<8x128xf32>
    %44 = tpu.matmul %42, %43, %cst_14 {dimension_numbers = #tpu.dot_dimension_numbers<[1], [0], [0], [1], [0, 0, 1, 1], [], []>} : vector<8x128xf32>, vector<128x128xf32>, vector<8x128xf32> -> vector<8x128xf32>
    %45 = vector.extract_strided_slice %44 {offsets = [0, 0], sizes = [8, 32], strides = [1, 1]} : vector<8x128xf32> to vector<8x32xf32>
    %c378 = arith.constant 378 : index
    %c0_15 = arith.constant 0 : index
    %46 = vector.load %arg2[%c378, %c0_15] : memref<392x128xf32, #tpu.memory_space<vmem>>, vector<1x32xf32>
    %47 = vector.broadcast %46 : vector<1x32xf32> to vector<8x32xf32>
    %48 = arith.addf %45, %47 : vector<8x32xf32>
    %49 = vector.extract_strided_slice %44 {offsets = [0, 32], sizes = [8, 32], strides = [1, 1]} : vector<8x128xf32> to vector<8x32xf32>
    %50 = vector.extract_strided_slice %44 {offsets = [0, 64], sizes = [8, 32], strides = [1, 1]} : vector<8x128xf32> to vector<8x32xf32>
    %51 = vector.extract_strided_slice %44 {offsets = [0, 96], sizes = [8, 4], strides = [1, 1]} : vector<8x128xf32> to vector<8x4xf32>
    %c379 = arith.constant 379 : index
    %c0_16 = arith.constant 0 : index
    %52 = vector.load %arg2[%c379, %c0_16] : memref<392x128xf32, #tpu.memory_space<vmem>>, vector<1x32xf32>
    %c380 = arith.constant 380 : index
    %c0_17 = arith.constant 0 : index
    %53 = vector.load %arg2[%c380, %c0_17] : memref<392x128xf32, #tpu.memory_space<vmem>>, vector<1x32xf32>
    %cst_18 = arith.constant dense<0.000000e+00> : vector<32xf32>
    %54 = vector.multi_reduction <add>, %48, %cst_18 [0] : vector<8x32xf32> to vector<32xf32>
    %55 = vector.shape_cast %54 : vector<32xf32> to vector<1x32xf32>
    %cst_19 = arith.constant 8.000000e+00 : f32
    %56 = vector.broadcast %cst_19 : f32 to vector<1x32xf32>
    %57 = arith.divf %55, %56 : vector<1x32xf32>
    %58 = arith.mulf %48, %48 : vector<8x32xf32>
    %cst_20 = arith.constant dense<0.000000e+00> : vector<32xf32>
    %59 = vector.multi_reduction <add>, %58, %cst_20 [0] : vector<8x32xf32> to vector<32xf32>
    %60 = vector.shape_cast %59 : vector<32xf32> to vector<1x32xf32>
    %cst_21 = arith.constant 8.000000e+00 : f32
    %61 = vector.broadcast %cst_21 : f32 to vector<1x32xf32>
    %62 = arith.divf %60, %61 : vector<1x32xf32>
    %63 = arith.mulf %57, %57 : vector<1x32xf32>
    %64 = arith.subf %62, %63 : vector<1x32xf32>
    %65 = vector.broadcast %57 : vector<1x32xf32> to vector<8x32xf32>
    %66 = arith.subf %48, %65 : vector<8x32xf32>
    %67 = vector.broadcast %52 : vector<1x32xf32> to vector<8x32xf32>
    %68 = arith.mulf %67, %66 : vector<8x32xf32>
    %cst_22 = arith.constant 9.99999974E-6 : f32
    %69 = vector.broadcast %cst_22 : f32 to vector<1x32xf32>
    %70 = arith.addf %64, %69 : vector<1x32xf32>
    %71 = math.rsqrt %70 : vector<1x32xf32>
    %72 = vector.broadcast %71 : vector<1x32xf32> to vector<8x32xf32>
    %73 = arith.mulf %68, %72 : vector<8x32xf32>
    %74 = vector.broadcast %53 : vector<1x32xf32> to vector<8x32xf32>
    %75 = arith.addf %73, %74 : vector<8x32xf32>
    %cst_23 = arith.constant 5.000000e-01 : f32
    %76 = vector.broadcast %cst_23 : f32 to vector<8x32xf32>
    %77 = arith.mulf %76, %75 : vector<8x32xf32>
    %cst_24 = arith.constant 0.707106769 : f32
    %78 = vector.broadcast %cst_24 : f32 to vector<8x32xf32>
    %79 = arith.mulf %75, %78 : vector<8x32xf32>
    %cst_25 = arith.constant 0.000000e+00 : f32
    %80 = vector.broadcast %cst_25 : f32 to vector<8x32xf32>
    %81 = arith.cmpf oge, %79, %80 : vector<8x32xf32>
    %cst_26 = arith.constant 1.000000e+00 : f32
    %cst_27 = arith.constant -1.000000e+00 : f32
    %82 = vector.broadcast %cst_26 : f32 to vector<8x32xf32>
    %83 = vector.broadcast %cst_27 : f32 to vector<8x32xf32>
    %84 = arith.select %81, %82, %83 : vector<8x32xi1>, vector<8x32xf32>
    %85 = math.absf %79 : vector<8x32xf32>
    %cst_28 = arith.constant 0.327591091 : f32
    %86 = vector.broadcast %cst_28 : f32 to vector<8x32xf32>
    %87 = arith.mulf %86, %85 : vector<8x32xf32>
    %cst_29 = arith.constant 1.000000e+00 : f32
    %88 = vector.broadcast %cst_29 : f32 to vector<8x32xf32>
    %89 = arith.addf %88, %87 : vector<8x32xf32>
    %90 = tpu.reciprocal %89 : vector<8x32xf32> -> vector<8x32xf32>
    %cst_30 = arith.constant 1.06140542 : f32
    %91 = vector.broadcast %cst_30 : f32 to vector<8x32xf32>
    %92 = arith.mulf %91, %90 : vector<8x32xf32>
    %cst_31 = arith.constant -1.45315206 : f32
    %93 = vector.broadcast %cst_31 : f32 to vector<8x32xf32>
    %94 = arith.addf %92, %93 : vector<8x32xf32>
    %95 = arith.mulf %94, %90 : vector<8x32xf32>
    %cst_32 = arith.constant 1.42141378 : f32
    %96 = vector.broadcast %cst_32 : f32 to vector<8x32xf32>
    %97 = arith.addf %95, %96 : vector<8x32xf32>
    %98 = arith.mulf %97, %90 : vector<8x32xf32>
    %cst_33 = arith.constant -0.284496725 : f32
    %99 = vector.broadcast %cst_33 : f32 to vector<8x32xf32>
    %100 = arith.addf %98, %99 : vector<8x32xf32>
    %101 = arith.mulf %100, %90 : vector<8x32xf32>
    %cst_34 = arith.constant 0.254829586 : f32
    %102 = vector.broadcast %cst_34 : f32 to vector<8x32xf32>
    %103 = arith.addf %101, %102 : vector<8x32xf32>
    %104 = arith.mulf %103, %90 : vector<8x32xf32>
    %cst_35 = arith.constant 0.000000e+00 : f32
    %105 = vector.broadcast %cst_35 : f32 to vector<8x32xf32>
    %106 = arith.subf %105, %85 : vector<8x32xf32>
    %107 = arith.mulf %106, %85 : vector<8x32xf32>
    %108 = math.exp %107 : vector<8x32xf32>
    %109 = arith.mulf %104, %108 : vector<8x32xf32>
    %cst_36 = arith.constant 1.000000e+00 : f32
    %110 = vector.broadcast %cst_36 : f32 to vector<8x32xf32>
    %111 = arith.subf %110, %109 : vector<8x32xf32>
    %112 = arith.mulf %84, %111 : vector<8x32xf32>
    %cst_37 = arith.constant 1.000000e+00 : f32
    %113 = vector.broadcast %cst_37 : f32 to vector<8x32xf32>
    %114 = arith.addf %113, %112 : vector<8x32xf32>
    %115 = arith.mulf %77, %114 : vector<8x32xf32>
    %cst_38 = arith.constant 0.70721358 : f32
    %116 = vector.broadcast %cst_38 : f32 to vector<8x32xf32>
    %117 = arith.mulf %115, %116 : vector<8x32xf32>
    %c280 = arith.constant 280 : index
    %c0_39 = arith.constant 0 : index
    %118 = vector.load %arg2[%c280, %c0_39] : memref<392x128xf32, #tpu.memory_space<vmem>>, vector<32x128xf32>
    %cst_40 = arith.constant dense<0.000000e+00> : vector<8x128xf32>
    %119 = tpu.matmul %117, %118, %cst_40 {dimension_numbers = #tpu.dot_dimension_numbers<[1], [0], [0], [1], [0, 0, 1, 1], [], []>} : vector<8x32xf32>, vector<32x128xf32>, vector<8x128xf32> -> vector<8x128xf32>
    %120 = vector.extract_strided_slice %119 {offsets = [0, 0], sizes = [8, 32], strides = [1, 1]} : vector<8x128xf32> to vector<8x32xf32>
    %121 = arith.addf %120, %49 : vector<8x32xf32>
    %c381 = arith.constant 381 : index
    %c0_41 = arith.constant 0 : index
    %122 = vector.load %arg2[%c381, %c0_41] : memref<392x128xf32, #tpu.memory_space<vmem>>, vector<1x32xf32>
    %123 = vector.broadcast %122 : vector<1x32xf32> to vector<8x32xf32>
    %124 = arith.addf %121, %123 : vector<8x32xf32>
    %c382 = arith.constant 382 : index
    %c0_42 = arith.constant 0 : index
    %125 = vector.load %arg2[%c382, %c0_42] : memref<392x128xf32, #tpu.memory_space<vmem>>, vector<1x32xf32>
    %c383 = arith.constant 383 : index
    %c0_43 = arith.constant 0 : index
    %126 = vector.load %arg2[%c383, %c0_43] : memref<392x128xf32, #tpu.memory_space<vmem>>, vector<1x32xf32>
    %cst_44 = arith.constant dense<0.000000e+00> : vector<32xf32>
    %127 = vector.multi_reduction <add>, %124, %cst_44 [0] : vector<8x32xf32> to vector<32xf32>
    %128 = vector.shape_cast %127 : vector<32xf32> to vector<1x32xf32>
    %cst_45 = arith.constant 8.000000e+00 : f32
    %129 = vector.broadcast %cst_45 : f32 to vector<1x32xf32>
    %130 = arith.divf %128, %129 : vector<1x32xf32>
    %131 = arith.mulf %124, %124 : vector<8x32xf32>
    %cst_46 = arith.constant dense<0.000000e+00> : vector<32xf32>
    %132 = vector.multi_reduction <add>, %131, %cst_46 [0] : vector<8x32xf32> to vector<32xf32>
    %133 = vector.shape_cast %132 : vector<32xf32> to vector<1x32xf32>
    %cst_47 = arith.constant 8.000000e+00 : f32
    %134 = vector.broadcast %cst_47 : f32 to vector<1x32xf32>
    %135 = arith.divf %133, %134 : vector<1x32xf32>
    %136 = arith.mulf %130, %130 : vector<1x32xf32>
    %137 = arith.subf %135, %136 : vector<1x32xf32>
    %138 = vector.broadcast %130 : vector<1x32xf32> to vector<8x32xf32>
    %139 = arith.subf %124, %138 : vector<8x32xf32>
    %140 = vector.broadcast %125 : vector<1x32xf32> to vector<8x32xf32>
    %141 = arith.mulf %140, %139 : vector<8x32xf32>
    %cst_48 = arith.constant 9.99999974E-6 : f32
    %142 = vector.broadcast %cst_48 : f32 to vector<1x32xf32>
    %143 = arith.addf %137, %142 : vector<1x32xf32>
    %144 = math.rsqrt %143 : vector<1x32xf32>
    %145 = vector.broadcast %144 : vector<1x32xf32> to vector<8x32xf32>
    %146 = arith.mulf %141, %145 : vector<8x32xf32>
    %147 = vector.broadcast %126 : vector<1x32xf32> to vector<8x32xf32>
    %148 = arith.addf %146, %147 : vector<8x32xf32>
    %cst_49 = arith.constant 5.000000e-01 : f32
    %149 = vector.broadcast %cst_49 : f32 to vector<8x32xf32>
    %150 = arith.mulf %149, %148 : vector<8x32xf32>
    %cst_50 = arith.constant 0.707106769 : f32
    %151 = vector.broadcast %cst_50 : f32 to vector<8x32xf32>
    %152 = arith.mulf %148, %151 : vector<8x32xf32>
    %cst_51 = arith.constant 0.000000e+00 : f32
    %153 = vector.broadcast %cst_51 : f32 to vector<8x32xf32>
    %154 = arith.cmpf oge, %152, %153 : vector<8x32xf32>
    %cst_52 = arith.constant 1.000000e+00 : f32
    %cst_53 = arith.constant -1.000000e+00 : f32
    %155 = vector.broadcast %cst_52 : f32 to vector<8x32xf32>
    %156 = vector.broadcast %cst_53 : f32 to vector<8x32xf32>
    %157 = arith.select %154, %155, %156 : vector<8x32xi1>, vector<8x32xf32>
    %158 = math.absf %152 : vector<8x32xf32>
    %cst_54 = arith.constant 0.327591091 : f32
    %159 = vector.broadcast %cst_54 : f32 to vector<8x32xf32>
    %160 = arith.mulf %159, %158 : vector<8x32xf32>
    %cst_55 = arith.constant 1.000000e+00 : f32
    %161 = vector.broadcast %cst_55 : f32 to vector<8x32xf32>
    %162 = arith.addf %161, %160 : vector<8x32xf32>
    %163 = tpu.reciprocal %162 : vector<8x32xf32> -> vector<8x32xf32>
    %cst_56 = arith.constant 1.06140542 : f32
    %164 = vector.broadcast %cst_56 : f32 to vector<8x32xf32>
    %165 = arith.mulf %164, %163 : vector<8x32xf32>
    %cst_57 = arith.constant -1.45315206 : f32
    %166 = vector.broadcast %cst_57 : f32 to vector<8x32xf32>
    %167 = arith.addf %165, %166 : vector<8x32xf32>
    %168 = arith.mulf %167, %163 : vector<8x32xf32>
    %cst_58 = arith.constant 1.42141378 : f32
    %169 = vector.broadcast %cst_58 : f32 to vector<8x32xf32>
    %170 = arith.addf %168, %169 : vector<8x32xf32>
    %171 = arith.mulf %170, %163 : vector<8x32xf32>
    %cst_59 = arith.constant -0.284496725 : f32
    %172 = vector.broadcast %cst_59 : f32 to vector<8x32xf32>
    %173 = arith.addf %171, %172 : vector<8x32xf32>
    %174 = arith.mulf %173, %163 : vector<8x32xf32>
    %cst_60 = arith.constant 0.254829586 : f32
    %175 = vector.broadcast %cst_60 : f32 to vector<8x32xf32>
    %176 = arith.addf %174, %175 : vector<8x32xf32>
    %177 = arith.mulf %176, %163 : vector<8x32xf32>
    %cst_61 = arith.constant 0.000000e+00 : f32
    %178 = vector.broadcast %cst_61 : f32 to vector<8x32xf32>
    %179 = arith.subf %178, %158 : vector<8x32xf32>
    %180 = arith.mulf %179, %158 : vector<8x32xf32>
    %181 = math.exp %180 : vector<8x32xf32>
    %182 = arith.mulf %177, %181 : vector<8x32xf32>
    %cst_62 = arith.constant 1.000000e+00 : f32
    %183 = vector.broadcast %cst_62 : f32 to vector<8x32xf32>
    %184 = arith.subf %183, %182 : vector<8x32xf32>
    %185 = arith.mulf %157, %184 : vector<8x32xf32>
    %cst_63 = arith.constant 1.000000e+00 : f32
    %186 = vector.broadcast %cst_63 : f32 to vector<8x32xf32>
    %187 = arith.addf %186, %185 : vector<8x32xf32>
    %188 = arith.mulf %150, %187 : vector<8x32xf32>
    %cst_64 = arith.constant 0.70721358 : f32
    %189 = vector.broadcast %cst_64 : f32 to vector<8x32xf32>
    %190 = arith.mulf %115, %189 : vector<8x32xf32>
    %191 = arith.addf %188, %190 : vector<8x32xf32>
    %cst_65 = arith.constant 0.70721358 : f32
    %192 = vector.broadcast %cst_65 : f32 to vector<8x32xf32>
    %193 = arith.mulf %191, %192 : vector<8x32xf32>
    %c312 = arith.constant 312 : index
    %c0_66 = arith.constant 0 : index
    %194 = vector.load %arg2[%c312, %c0_66] : memref<392x128xf32, #tpu.memory_space<vmem>>, vector<32x128xf32>
    %cst_67 = arith.constant dense<0.000000e+00> : vector<8x128xf32>
    %195 = tpu.matmul %193, %194, %cst_67 {dimension_numbers = #tpu.dot_dimension_numbers<[1], [0], [0], [1], [0, 0, 1, 1], [], []>} : vector<8x32xf32>, vector<32x128xf32>, vector<8x128xf32> -> vector<8x128xf32>
    %196 = vector.extract_strided_slice %195 {offsets = [0, 0], sizes = [8, 32], strides = [1, 1]} : vector<8x128xf32> to vector<8x32xf32>
    %197 = arith.addf %196, %50 : vector<8x32xf32>
    %c384 = arith.constant 384 : index
    %c0_68 = arith.constant 0 : index
    %198 = vector.load %arg2[%c384, %c0_68] : memref<392x128xf32, #tpu.memory_space<vmem>>, vector<1x32xf32>
    %199 = vector.broadcast %198 : vector<1x32xf32> to vector<8x32xf32>
    %200 = arith.addf %197, %199 : vector<8x32xf32>
    %c385 = arith.constant 385 : index
    %c0_69 = arith.constant 0 : index
    %201 = vector.load %arg2[%c385, %c0_69] : memref<392x128xf32, #tpu.memory_space<vmem>>, vector<1x32xf32>
    %c386 = arith.constant 386 : index
    %c0_70 = arith.constant 0 : index
    %202 = vector.load %arg2[%c386, %c0_70] : memref<392x128xf32, #tpu.memory_space<vmem>>, vector<1x32xf32>
    %cst_71 = arith.constant dense<0.000000e+00> : vector<32xf32>
    %203 = vector.multi_reduction <add>, %200, %cst_71 [0] : vector<8x32xf32> to vector<32xf32>
    %204 = vector.shape_cast %203 : vector<32xf32> to vector<1x32xf32>
    %cst_72 = arith.constant 8.000000e+00 : f32
    %205 = vector.broadcast %cst_72 : f32 to vector<1x32xf32>
    %206 = arith.divf %204, %205 : vector<1x32xf32>
    %207 = arith.mulf %200, %200 : vector<8x32xf32>
    %cst_73 = arith.constant dense<0.000000e+00> : vector<32xf32>
    %208 = vector.multi_reduction <add>, %207, %cst_73 [0] : vector<8x32xf32> to vector<32xf32>
    %209 = vector.shape_cast %208 : vector<32xf32> to vector<1x32xf32>
    %cst_74 = arith.constant 8.000000e+00 : f32
    %210 = vector.broadcast %cst_74 : f32 to vector<1x32xf32>
    %211 = arith.divf %209, %210 : vector<1x32xf32>
    %212 = arith.mulf %206, %206 : vector<1x32xf32>
    %213 = arith.subf %211, %212 : vector<1x32xf32>
    %214 = vector.broadcast %206 : vector<1x32xf32> to vector<8x32xf32>
    %215 = arith.subf %200, %214 : vector<8x32xf32>
    %216 = vector.broadcast %201 : vector<1x32xf32> to vector<8x32xf32>
    %217 = arith.mulf %216, %215 : vector<8x32xf32>
    %cst_75 = arith.constant 9.99999974E-6 : f32
    %218 = vector.broadcast %cst_75 : f32 to vector<1x32xf32>
    %219 = arith.addf %213, %218 : vector<1x32xf32>
    %220 = math.rsqrt %219 : vector<1x32xf32>
    %221 = vector.broadcast %220 : vector<1x32xf32> to vector<8x32xf32>
    %222 = arith.mulf %217, %221 : vector<8x32xf32>
    %223 = vector.broadcast %202 : vector<1x32xf32> to vector<8x32xf32>
    %224 = arith.addf %222, %223 : vector<8x32xf32>
    %cst_76 = arith.constant 5.000000e-01 : f32
    %225 = vector.broadcast %cst_76 : f32 to vector<8x32xf32>
    %226 = arith.mulf %225, %224 : vector<8x32xf32>
    %cst_77 = arith.constant 0.707106769 : f32
    %227 = vector.broadcast %cst_77 : f32 to vector<8x32xf32>
    %228 = arith.mulf %224, %227 : vector<8x32xf32>
    %cst_78 = arith.constant 0.000000e+00 : f32
    %229 = vector.broadcast %cst_78 : f32 to vector<8x32xf32>
    %230 = arith.cmpf oge, %228, %229 : vector<8x32xf32>
    %cst_79 = arith.constant 1.000000e+00 : f32
    %cst_80 = arith.constant -1.000000e+00 : f32
    %231 = vector.broadcast %cst_79 : f32 to vector<8x32xf32>
    %232 = vector.broadcast %cst_80 : f32 to vector<8x32xf32>
    %233 = arith.select %230, %231, %232 : vector<8x32xi1>, vector<8x32xf32>
    %234 = math.absf %228 : vector<8x32xf32>
    %cst_81 = arith.constant 0.327591091 : f32
    %235 = vector.broadcast %cst_81 : f32 to vector<8x32xf32>
    %236 = arith.mulf %235, %234 : vector<8x32xf32>
    %cst_82 = arith.constant 1.000000e+00 : f32
    %237 = vector.broadcast %cst_82 : f32 to vector<8x32xf32>
    %238 = arith.addf %237, %236 : vector<8x32xf32>
    %239 = tpu.reciprocal %238 : vector<8x32xf32> -> vector<8x32xf32>
    %cst_83 = arith.constant 1.06140542 : f32
    %240 = vector.broadcast %cst_83 : f32 to vector<8x32xf32>
    %241 = arith.mulf %240, %239 : vector<8x32xf32>
    %cst_84 = arith.constant -1.45315206 : f32
    %242 = vector.broadcast %cst_84 : f32 to vector<8x32xf32>
    %243 = arith.addf %241, %242 : vector<8x32xf32>
    %244 = arith.mulf %243, %239 : vector<8x32xf32>
    %cst_85 = arith.constant 1.42141378 : f32
    %245 = vector.broadcast %cst_85 : f32 to vector<8x32xf32>
    %246 = arith.addf %244, %245 : vector<8x32xf32>
    %247 = arith.mulf %246, %239 : vector<8x32xf32>
    %cst_86 = arith.constant -0.284496725 : f32
    %248 = vector.broadcast %cst_86 : f32 to vector<8x32xf32>
    %249 = arith.addf %247, %248 : vector<8x32xf32>
    %250 = arith.mulf %249, %239 : vector<8x32xf32>
    %cst_87 = arith.constant 0.254829586 : f32
    %251 = vector.broadcast %cst_87 : f32 to vector<8x32xf32>
    %252 = arith.addf %250, %251 : vector<8x32xf32>
    %253 = arith.mulf %252, %239 : vector<8x32xf32>
    %cst_88 = arith.constant 0.000000e+00 : f32
    %254 = vector.broadcast %cst_88 : f32 to vector<8x32xf32>
    %255 = arith.subf %254, %234 : vector<8x32xf32>
    %256 = arith.mulf %255, %234 : vector<8x32xf32>
    %257 = math.exp %256 : vector<8x32xf32>
    %258 = arith.mulf %253, %257 : vector<8x32xf32>
    %cst_89 = arith.constant 1.000000e+00 : f32
    %259 = vector.broadcast %cst_89 : f32 to vector<8x32xf32>
    %260 = arith.subf %259, %258 : vector<8x32xf32>
    %261 = arith.mulf %233, %260 : vector<8x32xf32>
    %cst_90 = arith.constant 1.000000e+00 : f32
    %262 = vector.broadcast %cst_90 : f32 to vector<8x32xf32>
    %263 = arith.addf %262, %261 : vector<8x32xf32>
    %264 = arith.mulf %226, %263 : vector<8x32xf32>
    %cst_91 = arith.constant 0.70721358 : f32
    %265 = vector.broadcast %cst_91 : f32 to vector<8x32xf32>
    %266 = arith.mulf %191, %265 : vector<8x32xf32>
    %267 = arith.addf %264, %266 : vector<8x32xf32>
    %c344 = arith.constant 344 : index
    %c0_92 = arith.constant 0 : index
    %268 = vector.load %arg2[%c344, %c0_92] : memref<392x128xf32, #tpu.memory_space<vmem>>, vector<32x128xf32>
    %cst_93 = arith.constant dense<0.000000e+00> : vector<8x128xf32>
    %269 = tpu.matmul %267, %268, %cst_93 {dimension_numbers = #tpu.dot_dimension_numbers<[1], [0], [0], [1], [0, 0, 1, 1], [], []>} : vector<8x32xf32>, vector<32x128xf32>, vector<8x128xf32> -> vector<8x128xf32>
    %270 = vector.extract_strided_slice %269 {offsets = [0, 0], sizes = [8, 4], strides = [1, 1]} : vector<8x128xf32> to vector<8x4xf32>
    %271 = arith.addf %270, %51 : vector<8x4xf32>
    %c387 = arith.constant 387 : index
    %c0_94 = arith.constant 0 : index
    %272 = vector.load %arg2[%c387, %c0_94] : memref<392x128xf32, #tpu.memory_space<vmem>>, vector<1x4xf32>
    %273 = vector.broadcast %272 : vector<1x4xf32> to vector<8x4xf32>
    %274 = arith.addf %271, %273 : vector<8x4xf32>
    %c0_95 = arith.constant 0 : index
    %c0_96 = arith.constant 0 : index
    %c0_97 = arith.constant 0 : index
    %275 = vector.load %arg3[%c0_95, %c0_96, %c0_97] : memref<1x8x4xf32, #tpu.memory_space<vmem>>, vector<1x8x4xf32>
    %276 = vector.shape_cast %275 : vector<1x8x4xf32> to vector<8x4xf32>
    %277 = vector.shape_cast %274 : vector<8x4xf32> to vector<1x8x4xf32>
    tpu.vector_store %arg3[%c0_95, %c0_96, %c0_97], %277 {strides = array<i32>} : memref<1x8x4xf32, #tpu.memory_space<vmem>>, vector<1x8x4xf32>,
    return
  }
  func.func @transform_0(%arg0: i32) -> (i32, i32, i32) {
    %c0_i32 = arith.constant 0 : i32
    %c0_i32_0 = arith.constant 0 : i32
    %c0_i32_1 = arith.constant 0 : i32
    return %arg0, %c0_i32, %c0_i32_0 : i32, i32, i32
  }
  func.func @transform_1(%arg0: i32) -> (i32, i32) {
    %c0_i32 = arith.constant 0 : i32
    %c0_i32_0 = arith.constant 0 : i32
    %c0_i32_1 = arith.constant 0 : i32
    return %c0_i32, %c0_i32_0 : i32, i32
  }
  func.func @transform_2(%arg0: i32) -> (i32, i32, i32) {
    %c0_i32 = arith.constant 0 : i32
    %c0_i32_0 = arith.constant 0 : i32
    %c0_i32_1 = arith.constant 0 : i32
    return %arg0, %c0_i32, %c0_i32_0 : i32, i32, i32
  }
}

</mosaic_0001>

<bundles_post_ra>
// kernel: tpu_custom_call.1
= control target key start
LH: loop header
LB: loop body
LE: loop exit
PB: predicated region body
PF: predicated region fallthrough
CT: control target
= control target key end

     0   :  { %7 = vsyncpa [#allocation3], 0  ;;  %s1812_s0 = inlined_call_operand.hbm [shape: f32[4,8,22], index: 0, kind: input, shape index: {}]   ;;  %s1813_s1 = inlined_call_operand.hbm [shape: f32[392,128], index: 1, kind: input, shape index: {}]   ;;  %s1814_s2 = inlined_call_operand.vmem [shape: f32[4,8,4], index: 2, kind: output, shape index: {}]  }
   0x1   :  { %9 = vsyncpa [#allocation3 + $0x1], 0 }
   0x2   :  { %10 = vsyncpa [#allocation5], 0  ;;  %s1592_s9 = smov 0   ;;  %s1594_s10 = smov 0  }
   0x3   :  { %s1596_s11 = smov 0   ;;  %s1598_s12 = smov 0  }
   0x4 LB: > { %s1611_s13 = sadd.s32 4294967295, %s1557_s12   ;;  %p36_p0 = scmp.ne.s32.totalorder %s1549_s10, %s1545_s9  ;;  %s1557_s12 = sphi %s1598_s12, %s1829_s12   ;;  %s1553_s11 = sphi %s1596_s11, %s1828_s11   ;;  %s1549_s10 = sphi %s1594_s10, %s1827_s10   ;;  %s1545_s9 = sphi %s1592_s9, %s1826_s9  }
   0x5   : > { %p1815_p1 = scmp.eq.s32.totalorder %s1611_s13, 0  ;;  %p1102_p2 = scmp.ge.s32.totalorder %s1557_s12, 1 }
   0x6   : > { %p94_p3 = scmp.lt.s32.totalorder %s1557_s12, 5  ;;  %s1559_s16 = smov [#allocation4]  }
   0x7   : > { %p1619_p4 = por %p1815_p1, %p36_p0  ;;  %s106_s17 = sshll.u32 %s1559_s16, 4  ;;  %s107_s17 = int_to_ptr.vmem [resolvable:$true] %s106_s17 }
   0x8   : > { %p1623_p5 = pnand %p1102_p2, %p94_p3  ;;  %s1636_s19 = sadd.s32 1, %s1557_s12  }
   0x9   : > { %s1818_s14 = scalar_select %p1619_p4, 1, 0 }
   0xa   : > { %s1819_s15 = scalar_select %p1623_p5, 1, 0 }
   0xb   : > { %p1378_p6 = pneg %p1623_p5  ;;  %s23_s20 = sadd.s32 1, %s1553_s11 }
   0xc   : > { %s20_s21 = ssub.s32 %s1557_s12, %s1636_s19  ;;  %s1461_s24 = scalar_lea.hbm %s1813_s1, 6272 }
   0xd   : > { %p1631_p7 = pnand %p1378_p6, %p1815_p1  ;;  %p1462_p8 = scmp.ne.s32.totalorder %s1813_s1, %s1461_s24 }
   0xe   : > { %p1468_p12 = scmp.lt.u32.totalorder %s1461_s24, %s1813_s1 }
   0xf   : > { %p1463_p9 = pneg %p1631_p7 }
  0x11   : > { %p1464_p10 = pnand %p1463_p9, %p1462_p8 }
  0x13   : > { %p1465_p11 = pneg %p1464_p10 }
  0x15   : > { %p1470_p13 = pnand %p1468_p12, %p1465_p11 }
  0x17   : > { %1473 = shalt.err (!%p1470_p13)
}
  0x18   : > { %s1474_s29 = scalar_lea.vmem %s107_s17, 6272  ;;  %p1482_p6 = scmp.lt.s32.totalorder %s107_s17, %s107_s17 }
  0x19   : > { %p1475_p0 = scmp.ne.s32.totalorder %s107_s17, %s1474_s29  ;;  %p1483_p1 = scmp.lt.s32.totalorder %s1474_s29, %s1474_s29 }
  0x1b   : > { %p1477_p2 = pnand %p1475_p0, %p1463_p9  ;;  %p1484_p4 = por %p1483_p1, %p1482_p6 }
  0x1d   : > { %p1478_p3 = pneg %p1477_p2 }
  0x1f   : > { %p1485_p5 = pnand %p1484_p4, %p1478_p3 }
  0x21   : > { %1488 = shalt.err (!%p1485_p5)
}
  0x22   : > { %s1560_s30 = smov 128   ;;  %s1561_s3 = smov 8  }
  0x23   : > { %1381 = dma.hbm_to_vmem [thread:$0]  (!%p1631_p7), %s1813_s1, 6272, %s107_s17, [#allocation5], %s1560_s30, %s1560_s30, %s1561_s3  }
  0x24   : > { %p21_p8 = scmp.eq.s32.totalorder %s20_s21, 0  ;;  %p30_p9 = scmp.ne.s32.totalorder %s1553_s11, %s1549_s10 }
  0x25   : > { %p31_p1 = scmp.eq.s32.totalorder %s1557_s12, 0  ;;  %p1387_p4 = scmp.lt.s32.totalorder %s1557_s12, 4 }
  0x26   : > { %s1662_s6 = scalar_select %p21_p8, %s1553_s11, %s23_s20  }
  0x27   : > { %p32_p5 = por %p31_p1, %p30_p9  ;;  %s120_s7 = sand.u32 1, %s1553_s11  }
  0x28   : > { %s1105_s8 = sshll.u32 %s120_s7, 3  ;;  %s1106_s9 = sshll.u32 %s1557_s12, 7 }
  0x29   : > { %s1669_s23 = scalar_lea.hbm %s1812_s0, %s1106_s9  ;;  %s124_s17 = scalar_lea.vmem [#allocation2], %s1105_s8 }
  0x2a   : > { %s131_s18 = sshll.u32 %s124_s17, 4  ;;  %p1673_p7 = pnand %p1387_p4, %p32_p5  ;;  %s1671_s18 = int_to_ptr.vmem [resolvable:$true] %s131_s18 }
  0x2b   : > { %s121_s12 = scalar_lea.sflag [#allocation3], %s120_s7  ;;  %s1489_s21 = scalar_lea.hbm %s1669_s23, 128 }
  0x2c   : > { %p1490_p10 = scmp.ne.s32.totalorder %s1669_s23, %s1489_s21  ;;  %p1491_p11 = pneg %p1673_p7 }
  0x2d   : > { %s1494_s26 = scalar_lea.hbm %s1812_s0, 512  ;;  %p1495_p0 = scmp.lt.u32.totalorder %s1669_s23, %s1812_s0 }
  0x2e   : > { %p1492_p12 = pnand %p1491_p11, %p1490_p10  ;;  %p1496_p2 = scmp.lt.u32.totalorder %s1494_s26, %s1489_s21 }
  0x2f   : > { %p1498_p6 = scmp.lt.u32.totalorder %s1489_s21, %s1669_s23 }
  0x30   : > { %p1493_p13 = pneg %p1492_p12  ;;  %p1497_p3 = por %p1496_p2, %p1495_p0 }
  0x32   : > { %p1499_p8 = por %p1498_p6, %p1497_p3 }
  0x34   : > { %p1500_p9 = pnand %p1499_p8, %p1493_p13 }
  0x36   : > { %1503 = shalt.err (!%p1500_p9)
}
  0x37   : > { %s1504_s29 = scalar_lea.vmem %s1671_s18, 128  ;;  %s1562_s30 = smov [#allocation2]  }
  0x38   : > { %p1505_p1 = scmp.ne.s32.totalorder %s1671_s18, %s1504_s29  ;;  %s1509_s3 = sshll.u32 %s1562_s30, 4  ;;  %s1510_s3 = int_to_ptr.vmem [resolvable:$false] %s1509_s3 }
  0x39   : > { %s1511_s4 = scalar_lea.vmem %s1510_s3, 256  ;;  %p1512_p10 = scmp.lt.s32.totalorder %s1671_s18, %s1510_s3 }
  0x3a   : > { %p1507_p4 = pnand %p1505_p1, %p1491_p11  ;;  %p1513_p12 = scmp.lt.s32.totalorder %s1511_s4, %s1504_s29 }
  0x3c   : > { %p1508_p5 = pneg %p1507_p4  ;;  %p1514_p0 = por %p1513_p12, %p1512_p10 }
  0x3e   : > { %p1515_p2 = pnand %p1514_p0, %p1508_p5 }
  0x40   : > { %1518 = shalt.err (!%p1515_p2)
}
  0x41   : > { %1385 = dma.hbm_to_vmem [thread:$0]  (!%p1673_p7), %s1669_s23, 128, %s1671_s18, %s121_s12  }
  0x42   : > { %p1822_p13 = scmp.ne.s32.totalorder %s1819_s15, 0 }
  0x43   : > { %s142_s5 = sand.u32 (!%p1822_p13), 1, %s1549_s10   ;;  %p1823_p11 = scmp.ne.s32.totalorder (!%p1822_p13), %s1818_s14, 0 }
  0x44   : > { %140 = sbr.rel (%p1822_p13) target bundleno = 1718 (0x6b6), region = 28  ;;  %s1108_s7 = sshll.u32 (!%p1822_p13), %s142_s5, 3 }
  0x45   : > { %s143_s8 = scalar_lea.sflag (!%p1822_p13), [#allocation3], %s142_s5  ;;  %s146_s9 = scalar_lea.vmem (!%p1822_p13), [#allocation2], %s1108_s7 }
  0x4b   : > { %1536 = dma.done.wait (%p1823_p11), %s143_s8, 128  }
  0x4c   : > { %1538 = vsyncadd (%p1823_p11), %s143_s8, 4294967168  ;;  %p1824_p3 = scmp.eq.s32.totalorder %s1611_s13, 0 }
  0x4e   : > { %1540 = dma.done.wait (%p1824_p3), [#allocation5], 6272   ;;  %p1825_p6 = pmov %p1824_p3 }
  0x4f   : > { %v1563_v0 = vmov 0.0|0.0   ;;  %vm1564_vm0 = vmmov 0   ;;  %v1565_v1 = vmov 0.0   ;;  %v177_v2 = vld [vmem:[#allocation4] sm:$0xff]  ;;  %v178_v3 = vld [vmem:[#allocation4 + $0x8] sm:$0xff]  ;;  %vm189_vm1 = vcmask 1045504  }
  0x50   : > { %1542 = vsyncadd (%p1825_p6), [#allocation5], 4294961024  ;;  %1299 = vmatprep.subr.bf16.mxu0 %v1563_v0  ;;  %1193 = vmatprep.mubr.msk.f32.mxu0 %vm1564_vm0, %v1565_v1  ;;  %v1300_v4 = vpack.c.bf16 %v178_v3, %v177_v2  ;;  %v179_v5 = vld [vmem:[#allocation4 + $0x10] sm:$0x3f]  ;;  %vm185_vm2 = vcmask 179200   ;;  %v378_v7 = vld [vmem:[#allocation4 + $0x18] sm:$0xff] }
  0x51   : > { %1302 = vmatprep.subr.bf16.mxu1 %v1563_v0  ;;  %1228 = vmatprep.mubr.msk.f32.mxu1 %vm1564_vm0, %v1565_v1  ;;  %v174_v6 = vld [vmem:[%s146_s9] sm:$0xff]  ;;  %v379_v8 = vld [vmem:[#allocation4 + $0x20] sm:$0xff]  ;;  %v380_v9 = vld [vmem:[#allocation4 + $0x28] sm:$0xff]  ;;  %v1566_v35 = vmov 21   ;;  %s1573_s14 = smov 64   ;;  %s1574_s15 = smov 96  }
  0x52   : > { %1301 = vmatpush3.bf16.msra.mxu0 %v1300_v4  ;;  %v1303_v10 = vpack.c.bf16 %v379_v8, %v378_v7  ;;  %v381_v11 = vld [vmem:[#allocation4 + $0x30] sm:$0xff]  ;;  %v382_v13 = vld [vmem:[#allocation4 + $0x38] sm:$0xff]  ;;  %v383_v14 = vld [vmem:[#allocation4 + $0x40] sm:$0xff]  ;;  %v470_v31 = vsub.f32 1.0, %v174_v6  ;;  %1438 = vset.pattern.permute.xlu0 %v1566_v35  ;;  %v1567_v7 = vmov 683565275  }
  0x53   : > { %1191 = vmatprep.subr.mxu0 %v1565_v1  ;;  %v1306_v12 = vpack.c.bf16 %v381_v11, %v380_v9  ;;  %v1309_v15 = vpack.c.bf16 %v383_v14, %v382_v13  ;;  %v384_v16 = vld [vmem:[#allocation4 + $0x48] sm:$0xff]  ;;  %v385_v17 = vld [vmem:[#allocation4 + $0x50] sm:$0xff]  ;;  %v386_v19 = vld [vmem:[#allocation4 + $0x58] sm:$0xff]  ;;  %v1568_v9 = vmov 2475754826   ;;  %s1575_s16 = smov 32  }
  0x54   : > { %1304 = vmatpush3.bf16.msra.mxu1 %v1303_v10  ;;  %v1312_v18 = vpack.c.bf16 %v385_v17, %v384_v16  ;;  %v387_v20 = vld [vmem:[#allocation4 + $0x60] sm:$0xff]  ;;  %v388_v22 = vld [vmem:[#allocation4 + $0x68] sm:$0xff]  ;;  %v389_v23 = vld [vmem:[#allocation4 + $0x70] sm:$0xff]  ;;  %v471_v38 = vsub.f32 0.0, %v470_v31  ;;  %p170_p7 = scmp.lt.s32.totalorder %s1611_s13, 3 }
  0x55   : > { %1305 = vmatprep.subr.bf16.mxu1 %v1563_v0  ;;  %v1315_v21 = vpack.c.bf16 %v387_v20, %v386_v19  ;;  %v1318_v24 = vpack.c.bf16 %v389_v23, %v388_v22  ;;  %v390_v25 = vld [vmem:[#allocation4 + $0x78] sm:$0xff]  ;;  %v391_v26 = vld [vmem:[#allocation4 + $0x80] sm:$0xff]  ;;  %v392_v28 = vld [vmem:[#allocation4 + $0x88] sm:$0xff] }
  0x56   : > { %1192 = vmatpush3.msk.msra.mxu0 %vm189_vm1, %v179_v5  ;;  %v1321_v27 = vpack.c.bf16 %v391_v26, %v390_v25  ;;  %v393_v29 = vld [vmem:[#allocation4 + $0x90] sm:$0xff]  ;;  %v481_v32 = vld [vmem:[#allocation4 + $0x98] sm:$0xff]  ;;  %v482_v33 = vld [vmem:[#allocation4 + $0xa0] sm:$0xff]  ;;  %476 = vperm.xlu0 %1438, %v471_v38   ;;  %s1831_s13 = smov (!%p170_p7, %s1611_s13), 3 }
  0x57   : > { %1194 = vmatmul.mubr.msk.f32.vlgmr.msra.gmra.mrb[0].mxu0 %vm185_vm2, %v174_v6  ;;  %1326 = vmatprep.subr.bf16.mxu0 %v1563_v0  ;;  %v1324_v30 = vpack.c.bf16 %v393_v29, %v392_v28  ;;  %v483_v34 = vld [vmem:[#allocation4 + $0xa8] sm:$0xff]  ;;  %v1327_v36 = vpack.c.bf16 %v482_v33, %v481_v32  ;;  %v484_v37 = vld [vmem:[#allocation4 + $0xb0] sm:$0xff]  ;;  %v485_v40 = vld [vmem:[#allocation4 + $0xb8] sm:$0xff]  ;;  %s1110_s22 = sshll.u32 %s1831_s13, 3 }
  0x58   : > { %1263 = vmatprep.mubr.msk.f32.mxu0 %vm1564_vm0, %v1565_v1  ;;  %1307 = vmatpush3.bf16.msra.mxu1 %v1306_v12  ;;  %v1330_v39 = vpack.c.bf16 %v484_v37, %v483_v34  ;;  %v486_v41 = vld [vmem:[#allocation4 + $0xc0] sm:$0xff]  ;;  %v487_v43 = vld [vmem:[#allocation4 + $0xc8] sm:$0xff]  ;;  %v488_v44 = vld [vmem:[#allocation4 + $0xd0] sm:$0xff]  ;;  %v1569_v12 = vmov 2131351028   ;;  %s173_s18 = scalar_lea.vmem %s1814_s2, %s1110_s22 }
  0x59   : > { %1308 = vmatprep.subr.bf16.mxu1 %v1563_v0  ;;  %1328 = vmatpush3.bf16.msra.mxu0 %v1327_v36  ;;  %v1333_v42 = vpack.c.bf16 %v486_v41, %v485_v40  ;;  %v1336_v45 = vpack.c.bf16 %v488_v44, %v487_v43  ;;  %v489_v46 = vld [vmem:[#allocation4 + $0xd8] sm:$0xff]  ;;  %v490_v47 = vld [vmem:[#allocation4 + $0xe0] sm:$0xff]  ;;  %v491_v49 = vld [vmem:[#allocation4 + $0xe8] sm:$0xff] }
  0x5a   : > { %1329 = vmatprep.subr.bf16.mxu0 %v1563_v0  ;;  %v1339_v48 = vpack.c.bf16 %v490_v47, %v489_v46  ;;  %v492_v50 = vld [vmem:[#allocation4 + $0xf0] sm:$0xff]  ;;  %v493_v52 = vld [vmem:[#allocation4 + $0xf8] sm:$0xff]  ;;  %v494_v53 = vld [vmem:[#allocation4 + $0x100] sm:$0xff] }
  0x5b   : > { %v1342_v51 = vpack.c.bf16 %v492_v50, %v491_v49  ;;  %v1345_v54 = vpack.c.bf16 %v494_v53, %v493_v52  ;;  %v1111_v55 = vld [vmem:[#allocation4 + $0x178] ss:$0 sm:$0xff] }
  0x5c   : > { %1310 = vmatpush3.bf16.msra.mxu1 %v1309_v15  ;;  %v1570_v15 = vmov 2102212464  }
  0x5d   : > { %1311 = vmatprep.subr.bf16.mxu1 %v1563_v0  ;;  %1331 = vmatpush3.bf16.msra.mxu0 %v1330_v39 }
  0x5e   : > { %1332 = vmatprep.subr.bf16.mxu0 %v1563_v0 }
  0x60   : > { %1313 = vmatpush3.bf16.msra.mxu1 %v1312_v18  ;;  %v1571_v18 = vmov 920167782  }
  0x61   : > { %1314 = vmatprep.subr.bf16.mxu1 %v1563_v0  ;;  %1334 = vmatpush3.bf16.msra.mxu0 %v1333_v42 }
  0x62   : > { %1335 = vmatprep.subr.bf16.mxu0 %v1563_v0 }
  0x64   : > { %1316 = vmatpush3.bf16.msra.mxu1 %v1315_v21  ;;  %v1572_v21 = vmov 1326507024  }
  0x65   : > { %1317 = vmatprep.subr.bf16.mxu1 %v1563_v0  ;;  %1337 = vmatpush3.bf16.msra.mxu0 %v1336_v45 }
  0x66   : > { %1338 = vmatprep.subr.bf16.mxu0 %v1563_v0 }
  0x68   : > { %1319 = vmatpush3.bf16.msra.mxu1 %v1318_v24 }
  0x69   : > { %1320 = vmatprep.subr.bf16.mxu1 %v1563_v0  ;;  %1340 = vmatpush3.bf16.msra.mxu0 %v1339_v48 }
  0x6a   : > { %1341 = vmatprep.subr.bf16.mxu0 %v1563_v0 }
  0x6c   : > { %1322 = vmatpush3.bf16.msra.mxu1 %v1321_v27 }
  0x6d   : > { %1323 = vmatprep.subr.bf16.mxu1 %v1563_v0  ;;  %1343 = vmatpush3.bf16.msra.mxu0 %v1342_v51 }
  0x6e   : > { %1344 = vmatprep.subr.bf16.mxu0 %v1563_v0 }
  0x70   : > { %1325 = vmatpush3.bf16.msra.mxu1 %v1324_v30 }
  0x71   : > { %1350 = vmatprep.subr.bf16.mxu1 %v1563_v0  ;;  %1346 = vmatpush3.bf16.msra.mxu0 %v1345_v54 }
  0x72   : > { %1347 = vmatprep.subr.bf16.mxu0 %v1563_v0 }
 0x12a   : > { %v259_v56 = vpop.f32.mrb[0].mxu0 }
 0x12b   : > { %v1738_v57 = vadd.f32 %v1111_v55, %v259_v56  ;;  %v1195_v58 = vpop.f32.mrb[1].mxu0 }
 0x12d   : > { %v271_v59 = vand.u32 2139095040, %v1738_v57  ;;  %v268_v63 = vand.u32 2147483647, %v1738_v57  ;;  %vm270_vm10 = vcmp.lt.s32.totalorder %v1738_v57, 0  ;;  %vm264_vm14 = vcmp.ge.f32.partialorder %v1738_v57, 0.0 }
 0x12f   : > { %v272_v60 = vshrl.u32 %v271_v59, 23  ;;  %v275_v4 = vand.u32 8388607, %v268_v63  ;;  %vm269_vm11 = vcmp.le.f32.partialorder %v268_v63, 0.7853982 }
 0x131   : > { %v1114_v61 = vadd.s32 4294967169, %v272_v60  ;;  %v276_v23 = vor.u32 8388608, %v275_v4 }
 0x133   : > { %v278_v62 = vadd.s32 1, %v1114_v61  ;;  %v316_v37 = vshll.u32 %v276_v23, 8 }
 0x135   : > { %vm279_vm3 = vcmp.gt.s32.totalorder %v278_v62, 0 }
 0x136   : > { %v280_v2 = vsel %vm279_vm3, %v278_v62, 0  ;;  %vm360_vm3 = vweird.f32 %v1738_v57 }
 0x137   : > { %v282_v3 = vand.u32 31, %v280_v2  ;;  %v281_v6 = vshrl.u32 %v280_v2, 5 }
 0x139   : > { %v283_v5 = vsub.s32 32, %v282_v3  ;;  %v285_v8 = vshll.u32 %v1567_v7, %v282_v3  ;;  %v288_v10 = vshll.u32 %v1568_v9, %v282_v3  ;;  %v291_v14 = vshll.u32 %v1569_v12, %v282_v3 }
 0x13a   : > { %v294_v17 = vshll.u32 %v1570_v15, %v282_v3  ;;  %v297_v20 = vshll.u32 %v1571_v18, %v282_v3  ;;  %vm300_vm4 = vcmp.lt.s32.totalorder %v281_v6, 1  ;;  %vm303_vm5 = vcmp.lt.s32.totalorder %v281_v6, 4 }
 0x13b   : > { %v286_v11 = vshrl.u32 %v1568_v9, %v283_v5  ;;  %v289_v13 = vshrl.u32 %v1569_v12, %v283_v5  ;;  %v292_v16 = vshrl.u32 %v1570_v15, %v283_v5  ;;  %v295_v19 = vshrl.u32 %v1571_v18, %v283_v5 }
 0x13c   : > { %v298_v22 = vshrl.u32 %v1572_v21, %v283_v5  ;;  %v284_v32 = vshrl.u32 %v1567_v7, %v283_v5  ;;  %vm302_vm6 = vcmp.lt.s32.totalorder %v281_v6, 3  ;;  %vm301_vm7 = vcmp.lt.s32.totalorder %v281_v6, 2 }
 0x13d   : > { %v287_v24 = vor.u32 %v286_v11, %v285_v8  ;;  %v290_v25 = vor.u32 %v289_v13, %v288_v10  ;;  %v293_v26 = vor.u32 %v292_v16, %v291_v14  ;;  %v296_v27 = vor.u32 %v295_v19, %v294_v17 }
 0x13e   : > { %v299_v28 = vor.u32 %v298_v22, %v297_v20  ;;  %v175_v19 = vlaneseq }
 0x13f   : > { %v305_v29 = vsel %vm303_vm5, %v293_v26, 2102212464  ;;  %v308_v30 = vsel %vm300_vm4, %v287_v24, %v290_v25  ;;  %v312_v31 = vsel %vm300_vm4, %v290_v25, %v293_v26  ;;  %v309_v33 = vsel %vm303_vm5, %v296_v27, 920167782 }
 0x140   : > { %v313_v34 = vsel %vm303_vm5, %v299_v28, 1326507024  ;;  %v310_v35 = vsel %vm302_vm6, %v293_v26, %v309_v33  ;;  %v304_v38 = vsel %vm300_vm4, %v284_v32, %v287_v24  ;;  %v306_v39 = vsel %vm302_vm6, %v290_v25, %v305_v29  ;;  %v495_v33 = vld [vmem:[#allocation4 + $0x108] sm:$0xff] }
 0x141   : > { %v314_v36 = vsel %vm302_vm6, %v296_v27, %v313_v34  ;;  %v311_v40 = vsel %vm301_vm7, %v308_v30, %v310_v35  ;;  %v307_v46 = vsel %vm301_vm7, %v304_v38, %v306_v39  ;;  %v176_v22 = vand.u32 127, %v175_v19  ;;  %v496_v34 = vld [vmem:[#allocation4 + $0x110] sm:$0xff] }
 0x142   : > { %v315_v41 = vsel %vm301_vm7, %v312_v31, %v314_v36  ;;  %v1747_v44 = vmul.u32.u64.low %v316_v37, %v311_v40  ;;  %v1748_v45 = vmul.u32.u64.high %v316_v37, %v311_v40, %v1747_v44  ;;  %v323_v48 = vmul.u32 %v316_v37, %v307_v46  ;;  %v477_v36 = vpop.permute.xlu0 %476  ;;  %v640_v46 = vld [vmem:[#allocation4 + $0x130] sm:$0xff] }
 0x143   : > { %v1744_v42 = vmul.u32.u64.low %v316_v37, %v315_v41  ;;  %v1745_v43 = vmul.u32.u64.high %v316_v37, %v315_v41, %v1744_v42  ;;  %v265_v26 = vmul.f32 0.01, %v1738_v57  ;;  %vm267_vm15 = vcmp.lt.s32.totalorder %v176_v22, 96  ;;  %v1118_v37 = vld [vmem:[#allocation4 + $0x179] ss:$0 sm:$0xff] }
 0x144   : > { %v326_v47 = vadd.s32 1, %v1748_v45  ;;  %vm263_vm2 = vcmp.lt.s32.totalorder %v176_v22, 64  ;;  %v1348_v35 = vpack.c.bf16 %v496_v34, %v495_v33  ;;  %vm469_vm4 = vcmp.lt.s32.totalorder %v176_v22, 32 }
 0x145   : > { %vm325_vm8 = vc.u32 %v1745_v43, %v1747_v44  ;;  %v324_v61 = vadd.s32 %v1747_v44, %v1745_v43  ;;  %v266_v30 = vsel %vm264_vm14, %v1738_v57, %v265_v26  ;;  %v479_v39 = vsel %vm469_vm4, %v477_v36, 1.0  ;;  %v638_v43 = vld [vmem:[#allocation4 + $0x120] sm:$0xff]  ;;  %v639_v44 = vld [vmem:[#allocation4 + $0x128] sm:$0xff] }
 0x146   : > { %v327_v49 = vsel %vm325_vm8, %v326_v47, %v1748_v45  ;;  %1349 = vmatpush3.bf16.msra.mxu0 %v1348_v35  ;;  %v1354_v47 = vpack.c.bf16 %v640_v46, %v639_v44  ;;  %vm575_vm5 = vcmask 261120   ;;  %v788_v44 = vld [vmem:[#allocation4 + $0x138] sm:$0xff]  ;;  %v790_v46 = vld [vmem:[#allocation4 + $0x148] sm:$0xff]  ;;  %vm1024_vm8 = vcmask 31744  }
 0x147   : > { %v328_v50 = vadd.s32 %v327_v49, %v323_v48  ;;  %1356 = vmatprep.subr.bf16.mxu0 %v1563_v0  ;;  %v1119_v48 = vld [vmem:[#allocation4 + $0x17a] ss:$0 sm:$0xff] }
 0x149   : > { %v329_v51 = vadd.s32 536870912, %v328_v50 }
 0x14b   : > { %v330_v52 = vshrl.u32 %v329_v51, 30 }
 0x14d   : > { %v331_v53 = vshll.u32 %v330_v52, 30  ;;  %v354_v12 = vsub.s32 4, %v330_v52 }
 0x14f   : > { %v332_v54 = vsub.s32 %v328_v50, %v331_v53  ;;  %v355_v15 = vsel %vm270_vm10, %v354_v12, %v330_v52 }
 0x150   : > { %v357_v17 = vsel %vm269_vm11, 0, %v355_v15 }
 0x151   : > { %v334_v55 = vsub.s32 0, %v332_v54  ;;  %v361_v18 = vadd.s32 3, %v357_v17 }
 0x153   : > { %v1115_v56 = vmin.u32 %v334_v55, %v332_v54  ;;  %v362_v20 = vand.u32 3, %v361_v18 }
 0x155   : > { %v336_v58 = vclz %v1115_v56  ;;  %vm367_vm12 = vcmp.eq.s32.totalorder %v362_v20, 2  ;;  %vm364_vm13 = vcmp.eq.s32.totalorder %v362_v20, 0  ;;  %vm363_vm1 = vcmp.lt.s32.totalorder %v362_v20, 2 }
 0x157   : > { %v1116_v59 = vadd.s32 4294967294, %v336_v58 }
 0x159   : > { %vm1117_vm9 = vcmp.lt.s32.totalorder %v1116_v59, 0 }
 0x15a   : > { %v339_v60 = vsel %vm1117_vm9, 0, %v1116_v59 }
 0x15b   : > { %v340_v62 = vsub.s32 32, %v339_v60  ;;  %v344_v2 = vsub.s32 4294967266, %v339_v60  ;;  %v341_v3 = vshll.u32 %v332_v54, %v339_v60 }
 0x15d   : > { %v342_v4 = vshrl.u32 %v324_v61, %v340_v62  ;;  %v345_v5 = vadd.s32 127, %v344_v2 }
 0x15f   : > { %v343_v6 = vor.u32 %v342_v4, %v341_v3  ;;  %v346_v7 = vshll.u32 %v345_v5, 23 }
 0x161   : > { %v347_v8 = vor.u32 4788187, %v346_v7  ;;  %v350_v10 = vcvt.s32.f32 %v343_v6 }
 0x163   : > { %v348_v9 = vand.u32 2147483647, %v347_v8 }
 0x165   : > { %v351_v11 = vmul.f32 %v350_v10, %v348_v9 }
 0x167   : > { %v352_v13 = vxor.u32 2147483648, %v351_v11 }
 0x169   : > { %v353_v14 = vsel %vm270_vm10, %v352_v13, %v351_v11  ;;  %v1120_v13 = vld [vmem:[#allocation4 + $0x17b] ss:$0 sm:$0xff] }
 0x16a   : > { %v356_v16 = vsel %vm269_vm11, %v1738_v57, %v353_v14 }
 0x16b   : > { %1439 = vcosq.f32 %v356_v16 }
 0x16c   : > { %1441 = vsinq.f32 %v356_v16  ;;  %v1121_v16 = vld [vmem:[#allocation4 + $0x17c] ss:$0 sm:$0xff] }
 0x175   : > { %v1440_v21 = vpop.eup %1439 }
 0x176   : > { %v1442_v23 = vpop.eup %1441  ;;  %v368_v24 = vxor.u32 2147483648, %v1440_v21 }
 0x177   : > { %v365_v25 = vxor.u32 2147483648, %v1442_v23 }
 0x178   : > { %v369_v63 = vsel %vm367_vm12, %v368_v24, %v1442_v23 }
 0x179   : > { %v366_v27 = vsel %vm364_vm13, %v1440_v21, %v365_v25 }
 0x17a   : > { %v370_v28 = vsel %vm363_vm1, %v366_v27, %v369_v63 }
 0x17b   : > { %v371_v29 = vsel %vm360_vm3, nan, %v370_v28 }
 0x17c   : > { %v374_v31 = vsel %vm267_vm15, %v371_v29, %v1738_v57  ;;  %v637_v57 = vld [vmem:[#allocation4 + $0x118] sm:$0xff] }
 0x17d   : > { %v377_v32 = vsel %vm263_vm2, %v266_v30, %v374_v31  ;;  %v1351_v45 = vpack.c.bf16 %v638_v43, %v637_v57 }
 0x17e   : > { %1229 = vmatmul.mubr.f32.vlgmr.msra.gmra.mrb[0].mxu1 %v377_v32 }
 0x17f   : > { %1274 = vmatprep.mubr.msk.f32.mxu1 %vm1564_vm0, %v1565_v1  ;;  %1352 = vmatpush3.bf16.msra.mxu1 %v1351_v45  ;;  %v789_v45 = vld [vmem:[#allocation4 + $0x140] sm:$0xff] }
 0x180   : > { %1353 = vmatprep.subr.bf16.mxu1 %v1563_v0 }
 0x183   : > { %1355 = vmatpush3.bf16.msra.mxu1 %v1354_v47  ;;  %v1357_v47 = vpack.c.bf16 %v789_v45, %v788_v44 }
 0x184   : > { %1362 = vmatprep.subr.bf16.mxu1 %v1563_v0 }
 0x251   : > { %v465_v38 = vpop.f32.mrb[0].mxu1 }
 0x252   : > { %v466_v40 = vadd.f32 %v1118_v37, %v465_v38  ;;  %v1230_v41 = vpop.f32.mrb[1].mxu1  ;;  %v1576_v38 = vmov -1.0  }
 0x254   : > { %v480_v42 = vmul.f32 %v479_v39, %v466_v40 }
 0x256   : > { %1264 = vmatmul.mubr.f32.vlgmr.msra.gmra.mrb[2].mxu0 %v480_v42 }
 0x257   : > { %1285 = vmatprep.mubr.msk.f32.mxu0 %vm1564_vm0, %v1565_v1  ;;  %1358 = vmatpush3.bf16.msra.mxu0 %v1357_v47 }
 0x258   : > { %1359 = vmatprep.subr.bf16.mxu0 %v1563_v0 }
 0x329   : > { %v563_v49 = vpop.f32.mrb[2].mxu0 }
 0x32a   : > { %v572_v50 = vadd.f32 %v1119_v48, %v563_v49  ;;  %865 = vrot.lane.b32.xlu1 %v563_v49, %s1573_s14  ;;  %715 = vrot.lane.b32.xlu0 %v563_v49, %s1574_s15  ;;  %v1265_v51 = vpop.f32.mrb[3].mxu0  ;;  %v791_v48 = vld [vmem:[#allocation4 + $0x150] sm:$0xff] }
 0x32c   : > { %v576_v52 = vsel %vm575_vm5, %v572_v50, 0.0  ;;  %v585_v53 = vmul.f32 %v572_v50, %v572_v50 }
 0x32d   : > { %v577_v54 = vrot.slane %v576_v52, 4 }
 0x32e   : > { %v586_v55 = vsel %vm575_vm5, %v585_v53, 0.0  ;;  %1014 = vrot.lane.b32.xlu1 %v563_v49, %s1575_s16  ;;  %v1360_v49 = vpack.c.bf16 %v791_v48, %v790_v46 }
 0x32f   : > { %v578_v56 = vadd.f32 %v577_v54, %v576_v52  ;;  %v587_v58 = vrot.slane %v586_v55, 4  ;;  %v1123_v52 = vld [vmem:[#allocation4 + $0x17d] ss:$0 sm:$0xff] }
 0x330   : > { %1361 = vmatpush3.bf16.msra.mxu0 %v1360_v49  ;;  %v937_v49 = vld [vmem:[#allocation4 + $0x158] sm:$0xff] }
 0x331   : > { %v579_v59 = vrot.slane %v578_v56, 2  ;;  %v588_v60 = vadd.f32 %v587_v58, %v586_v55 }
 0x333   : > { %v580_v61 = vadd.f32 %v579_v59, %v578_v56  ;;  %v589_v62 = vrot.slane %v588_v60, 2 }
 0x335   : > { %v581_v2 = vrot.slane %v580_v61, 1  ;;  %v590_v3 = vadd.f32 %v589_v62, %v588_v60 }
 0x337   : > { %v582_v4 = vadd.f32 %v581_v2, %v580_v61  ;;  %v591_v5 = vrot.slane %v590_v3, 1 }
 0x339   : > { %v584_v6 = vmul.f32 0.125, %v582_v4  ;;  %v592_v7 = vadd.f32 %v591_v5, %v590_v3 }
 0x33b   : > { %v593_v8 = vmul.f32 0.125, %v592_v7  ;;  %v594_v9 = vmul.f32 %v584_v6, %v584_v6  ;;  %v596_v12 = vsub.f32 %v572_v50, %v584_v6 }
 0x33d   : > { %v595_v10 = vsub.f32 %v593_v8, %v594_v9  ;;  %v601_v14 = vmul.f32 %v1120_v13, %v596_v12 }
 0x33f   : > { %v602_v11 = vadd.f32 1e-05, %v595_v10 }
 0x341   : > { %1443 = vrsqrt.f32 %v602_v11 }
 0x34b   : > { %v1444_v15 = vpop.eup %1443 }
 0x34c   : > { %v604_v17 = vmul.f32 %v1444_v15, %v601_v14 }
 0x34e   : > { %v609_v18 = vadd.f32 %v1121_v16, %v604_v17  ;;  %v1124_v16 = vld [vmem:[#allocation4 + $0x17e] ss:$0 sm:$0xff] }
 0x350   : > { %v611_v19 = vmul.f32 0.70710677, %v609_v18  ;;  %v610_v41 = vmul.f32 0.5, %v609_v18 }
 0x352   : > { %v614_v20 = vand.u32 2147483647, %v611_v19  ;;  %vm612_vm6 = vcmp.ge.f32.partialorder %v611_v19, 0.0  ;;  %v1125_v19 = vld [vmem:[#allocation4 + $0x17f] ss:$0 sm:$0xff] }
 0x353   : > { %v613_v39 = vsel %vm612_vm6, 1.0, %v1576_v38 }
 0x354   : > { %v615_v21 = vmul.f32 0.3275911, %v614_v20  ;;  %v627_v23 = vsub.f32 0.0, %v614_v20 }
 0x356   : > { %v616_v22 = vadd.f32 1.0, %v615_v21  ;;  %v628_v25 = vmul.f32 %v627_v23, %v614_v20 }
 0x358   : > { %1445 = vrcp.f32 %v616_v22  ;;  %v629_v27 = vmul.f32 1.442695, %v628_v25 }
 0x35a   : > { %1447 = vpow2.f32 %v629_v27 }
 0x362   : > { %v1446_v24 = vpop.eup %1445 }
 0x363   : > { %v618_v26 = vmul.f32 1.0614054, %v1446_v24 }
 0x364   : > { %v1448_v35 = vpop.eup %1447 }
 0x365   : > { %v619_v63 = vadd.f32 -1.4531521, %v618_v26 }
 0x367   : > { %v620_v28 = vmul.f32 %v1446_v24, %v619_v63 }
 0x369   : > { %v621_v29 = vadd.f32 1.4214138, %v620_v28 }
 0x36b   : > { %v622_v30 = vmul.f32 %v1446_v24, %v621_v29 }
 0x36d   : > { %v623_v31 = vadd.f32 -0.28449672, %v622_v30 }
 0x36f   : > { %v624_v32 = vmul.f32 %v1446_v24, %v623_v31 }
 0x371   : > { %v625_v33 = vadd.f32 0.2548296, %v624_v32 }
 0x373   : > { %v626_v34 = vmul.f32 %v1446_v24, %v625_v33 }
 0x375   : > { %v631_v36 = vmul.f32 %v1448_v35, %v626_v34 }
 0x377   : > { %v632_v37 = vsub.f32 1.0, %v631_v36 }
 0x379   : > { %v633_v40 = vmul.f32 %v632_v37, %v613_v39 }
 0x37b   : > { %v634_v42 = vadd.f32 1.0, %v633_v40 }
 0x37d   : > { %v635_v57 = vmul.f32 %v634_v42, %v610_v41 }
 0x37f   : > { %v1773_v43 = vmul.f32 0.7072136, %v635_v57 }
 0x381   : > { %1275 = vmatmul.mubr.msk.f32.vlgmr.msra.gmra.mrb[2].mxu1 %vm575_vm5, %v1773_v43 }
 0x382   : > { %1296 = vmatprep.mubr.msk.f32.mxu1 %vm1564_vm0, %v1565_v1 }
 0x39c   : > { %v716_v50 = vpop.permute.xlu0 %715 }
 0x454   : > { %v710_v51 = vpop.f32.mrb[2].mxu1 }
 0x455   : > { %v718_v53 = vadd.f32 %v716_v50, %v710_v51  ;;  %v1276_v54 = vpop.f32.mrb[3].mxu1  ;;  %v938_v50 = vld [vmem:[#allocation4 + $0x160] sm:$0xff]  ;;  %v939_v51 = vld [vmem:[#allocation4 + $0x168] sm:$0xff] }
 0x457   : > { %v724_v55 = vadd.f32 %v1123_v52, %v718_v53  ;;  %v1363_v52 = vpack.c.bf16 %v938_v50, %v937_v49  ;;  %v940_v53 = vld [vmem:[#allocation4 + $0x170] sm:$0xff] }
 0x458   : > { %v1366_v54 = vpack.c.bf16 %v940_v53, %v939_v51 }
 0x459   : > { %v727_v56 = vsel %vm575_vm5, %v724_v55, 0.0  ;;  %v735_v58 = vmul.f32 %v724_v55, %v724_v55  ;;  %1364 = vmatpush3.bf16.msra.mxu1 %v1363_v52 }
 0x45a   : > { %v728_v1 = vrot.slane %v727_v56, 4  ;;  %1365 = vmatprep.subr.bf16.mxu1 %v1563_v0 }
 0x45b   : > { %v736_v59 = vsel %vm575_vm5, %v735_v58, 0.0  ;;  %v1127_v58 = vld [vmem:[#allocation4 + $0x180] ss:$0 sm:$0xff] }
 0x45c   : > { %v729_v60 = vadd.f32 %v728_v1, %v727_v56  ;;  %v737_v61 = vrot.slane %v736_v59, 4 }
 0x45d   : > { %1367 = vmatpush3.bf16.msra.mxu1 %v1366_v54  ;;  %v1131_v54 = vld [vmem:[#allocation4 + $0x183] ss:$0 sm:$0xff] }
 0x45e   : > { %v730_v62 = vrot.slane %v729_v60, 2  ;;  %v738_v2 = vadd.f32 %v737_v61, %v736_v59 }
 0x460   : > { %v731_v3 = vadd.f32 %v730_v62, %v729_v60  ;;  %v739_v4 = vrot.slane %v738_v2, 2 }
 0x462   : > { %v732_v5 = vrot.slane %v731_v3, 1  ;;  %v740_v6 = vadd.f32 %v739_v4, %v738_v2 }
 0x464   : > { %v733_v7 = vadd.f32 %v732_v5, %v731_v3  ;;  %v741_v8 = vrot.slane %v740_v6, 1 }
 0x466   : > { %v734_v9 = vmul.f32 0.125, %v733_v7  ;;  %v742_v10 = vadd.f32 %v741_v8, %v740_v6 }
 0x468   : > { %v743_v11 = vmul.f32 0.125, %v742_v10  ;;  %v744_v12 = vmul.f32 %v734_v9, %v734_v9  ;;  %v746_v15 = vsub.f32 %v724_v55, %v734_v9  ;;  %v866_v55 = vpop.permute.xlu1 %865 }
 0x46a   : > { %v745_v13 = vsub.f32 %v743_v11, %v744_v12  ;;  %v751_v17 = vmul.f32 %v1124_v16, %v746_v15 }
 0x46c   : > { %v752_v14 = vadd.f32 1e-05, %v745_v13  ;;  %v1015_v52 = vpop.permute.xlu1 %1014 }
 0x46e   : > { %1449 = vrsqrt.f32 %v752_v14 }
 0x478   : > { %v1450_v18 = vpop.eup %1449 }
 0x479   : > { %v754_v20 = vmul.f32 %v1450_v18, %v751_v17 }
 0x47b   : > { %v759_v21 = vadd.f32 %v1125_v19, %v754_v20  ;;  %v1128_v19 = vld [vmem:[#allocation4 + $0x181] ss:$0 sm:$0xff] }
 0x47d   : > { %v761_v22 = vmul.f32 0.70710677, %v759_v21  ;;  %v760_v44 = vmul.f32 0.5, %v759_v21 }
 0x47f   : > { %v764_v23 = vand.u32 2147483647, %v761_v22  ;;  %vm762_vm0 = vcmp.ge.f32.partialorder %v761_v22, 0.0  ;;  %v1129_v22 = vld [vmem:[#allocation4 + $0x182] ss:$0 sm:$0xff] }
 0x480   : > { %v763_v42 = vsel %vm762_vm0, 1.0, %v1576_v38 }
 0x481   : > { %v765_v24 = vmul.f32 0.3275911, %v764_v23  ;;  %v777_v26 = vsub.f32 0.0, %v764_v23 }
 0x483   : > { %v766_v25 = vadd.f32 1.0, %v765_v24  ;;  %v778_v27 = vmul.f32 %v777_v26, %v764_v23 }
 0x485   : > { %1451 = vrcp.f32 %v766_v25  ;;  %v779_v30 = vmul.f32 1.442695, %v778_v27 }
 0x487   : > { %1453 = vpow2.f32 %v779_v30 }
 0x48f   : > { %v1452_v63 = vpop.eup %1451 }
 0x490   : > { %v768_v28 = vmul.f32 1.0614054, %v1452_v63 }
 0x491   : > { %v1454_v39 = vpop.eup %1453 }
 0x492   : > { %v769_v29 = vadd.f32 -1.4531521, %v768_v28 }
 0x494   : > { %v770_v31 = vmul.f32 %v1452_v63, %v769_v29 }
 0x496   : > { %v771_v32 = vadd.f32 1.4214138, %v770_v31 }
 0x498   : > { %v772_v33 = vmul.f32 %v1452_v63, %v771_v32 }
 0x49a   : > { %v773_v34 = vadd.f32 -0.28449672, %v772_v33 }
 0x49c   : > { %v774_v35 = vmul.f32 %v1452_v63, %v773_v34 }
 0x49e   : > { %v775_v36 = vadd.f32 0.2548296, %v774_v35 }
 0x4a0   : > { %v776_v37 = vmul.f32 %v1452_v63, %v775_v36 }
 0x4a2   : > { %v781_v40 = vmul.f32 %v1454_v39, %v776_v37 }
 0x4a4   : > { %v782_v41 = vsub.f32 1.0, %v781_v40 }
 0x4a6   : > { %v783_v57 = vmul.f32 %v782_v41, %v763_v42 }
 0x4a8   : > { %v784_v45 = vadd.f32 1.0, %v783_v57 }
 0x4aa   : > { %v785_v46 = vmul.f32 %v784_v45, %v760_v44 }
 0x4ac   : > { %v786_v47 = vadd.f32 %v785_v46, %v1773_v43 }
 0x4ae   : > { %v1784_v48 = vmul.f32 0.7072136, %v786_v47 }
 0x4b0   : > { %1286 = vmatmul.mubr.msk.f32.vlgmr.msra.gmra.mrb[4].mxu0 %vm575_vm5, %v1784_v48 }
 0x583   : > { %v861_v56 = vpop.f32.mrb[4].mxu0 }
 0x584   : > { %v868_v1 = vadd.f32 %v866_v55, %v861_v56  ;;  %v1287_v43 = vpop.f32.mrb[5].mxu0 }
 0x586   : > { %v874_v59 = vadd.f32 %v1127_v58, %v868_v1 }
 0x588   : > { %v877_v60 = vsel %vm575_vm5, %v874_v59, 0.0  ;;  %v885_v61 = vmul.f32 %v874_v59, %v874_v59 }
 0x589   : > { %v878_v62 = vrot.slane %v877_v60, 4 }
 0x58a   : > { %v886_v2 = vsel %vm575_vm5, %v885_v61, 0.0 }
 0x58b   : > { %v879_v3 = vadd.f32 %v878_v62, %v877_v60  ;;  %v887_v4 = vrot.slane %v886_v2, 4 }
 0x58d   : > { %v880_v5 = vrot.slane %v879_v3, 2  ;;  %v888_v6 = vadd.f32 %v887_v4, %v886_v2 }
 0x58f   : > { %v881_v7 = vadd.f32 %v880_v5, %v879_v3  ;;  %v889_v8 = vrot.slane %v888_v6, 2 }
 0x591   : > { %v882_v0 = vrot.slane %v881_v7, 1  ;;  %v890_v9 = vadd.f32 %v889_v8, %v888_v6 }
 0x593   : > { %v883_v10 = vadd.f32 %v882_v0, %v881_v7  ;;  %v891_v11 = vrot.slane %v890_v9, 1 }
 0x595   : > { %v884_v12 = vmul.f32 0.125, %v883_v10  ;;  %v892_v13 = vadd.f32 %v891_v11, %v890_v9 }
 0x597   : > { %v893_v14 = vmul.f32 0.125, %v892_v13  ;;  %v894_v15 = vmul.f32 %v884_v12, %v884_v12  ;;  %v896_v18 = vsub.f32 %v874_v59, %v884_v12 }
 0x599   : > { %v895_v16 = vsub.f32 %v893_v14, %v894_v15  ;;  %v901_v20 = vmul.f32 %v1128_v19, %v896_v18 }
 0x59b   : > { %v902_v17 = vadd.f32 1e-05, %v895_v16 }
 0x59d   : > { %1455 = vrsqrt.f32 %v902_v17 }
 0x5a7   : > { %v1456_v21 = vpop.eup %1455 }
 0x5a8   : > { %v904_v23 = vmul.f32 %v1456_v21, %v901_v20 }
 0x5aa   : > { %v909_v24 = vadd.f32 %v1129_v22, %v904_v23 }
 0x5ac   : > { %v911_v25 = vmul.f32 0.70710677, %v909_v24  ;;  %v910_v47 = vmul.f32 0.5, %v909_v24 }
 0x5ae   : > { %v914_v26 = vand.u32 2147483647, %v911_v25  ;;  %vm912_vm7 = vcmp.ge.f32.partialorder %v911_v25, 0.0 }
 0x5af   : > { %v913_v45 = vsel %vm912_vm7, 1.0, %v1576_v38 }
 0x5b0   : > { %v915_v63 = vmul.f32 0.3275911, %v914_v26  ;;  %v927_v28 = vsub.f32 0.0, %v914_v26 }
 0x5b2   : > { %v916_v27 = vadd.f32 1.0, %v915_v63  ;;  %v928_v30 = vmul.f32 %v927_v28, %v914_v26 }
 0x5b4   : > { %1457 = vrcp.f32 %v916_v27  ;;  %v929_v33 = vmul.f32 1.442695, %v928_v30 }
 0x5b6   : > { %1459 = vpow2.f32 %v929_v33 }
 0x5be   : > { %v1458_v29 = vpop.eup %1457 }
 0x5bf   : > { %v918_v31 = vmul.f32 1.0614054, %v1458_v29 }
 0x5c0   : > { %v1460_v42 = vpop.eup %1459 }
 0x5c1   : > { %v919_v32 = vadd.f32 -1.4531521, %v918_v31 }
 0x5c3   : > { %v920_v34 = vmul.f32 %v1458_v29, %v919_v32 }
 0x5c5   : > { %v921_v35 = vadd.f32 1.4214138, %v920_v34 }
 0x5c7   : > { %v922_v36 = vmul.f32 %v1458_v29, %v921_v35 }
 0x5c9   : > { %v923_v37 = vadd.f32 -0.28449672, %v922_v36 }
 0x5cb   : > { %v924_v39 = vmul.f32 %v1458_v29, %v923_v37 }
 0x5cd   : > { %v925_v40 = vadd.f32 0.2548296, %v924_v39 }
 0x5cf   : > { %v926_v41 = vmul.f32 %v1458_v29, %v925_v40 }
 0x5d1   : > { %v931_v57 = vmul.f32 %v1460_v42, %v926_v41 }
 0x5d3   : > { %v932_v44 = vsub.f32 1.0, %v931_v57 }
 0x5d5   : > { %v933_v46 = vmul.f32 %v932_v44, %v913_v45 }
 0x5d7   : > { %v934_v49 = vadd.f32 1.0, %v933_v46 }
 0x5d9   : > { %v935_v50 = vmul.f32 %v934_v49, %v910_v47 }
 0x5db   : > { %v936_v51 = vadd.f32 %v935_v50, %v1784_v48 }
 0x5dd   : > { %1297 = vmatmul.mubr.msk.f32.vlgmr.msra.gmra.mrb[4].mxu1 %vm575_vm5, %v936_v51 }
 0x6b0   : > { %v1010_v53 = vpop.f32.mrb[4].mxu1 }
 0x6b1   : > { %v1017_v55 = vadd.f32 %v1015_v52, %v1010_v53  ;;  %v1298_v56 = vpop.f32.mrb[5].mxu1 }
 0x6b3   : > { %v1023_v38 = vadd.f32 %v1131_v54, %v1017_v55 }
 0x6b5   : > { %1025 = vst.msk [vmem:[%s173_s18] sm:$0xff] %vm1024_vm8, %v1023_v38 }
 0x6b6 PF: > { %p13_p8 = scmp.ge.s32.totalorder %s1636_s19, 6   ;;  %s1826_s9 = smov %s1549_s10 }
 0x6b7   : > { %s1827_s10 = smov %s1553_s11  ;;  %s1828_s11 = smov %s1662_s6 }
 0x6b8   : > { %s1829_s12 = smov %s1636_s19  ;;  %15 = sbr.rel (!%p13_p8) target bundleno = 4 (0x4), region = 72 }
 0x6bf   :  { %1045 = vsyncpa [#allocation3], 1 }
 0x6c0   :  { %1047 = vsyncpa [#allocation3 + $0x1], 1 }
 0x6c1   :  { %1048 = vsyncpa [#allocation5], 1 }

</bundles_post_ra>
